<compile_context>
chip_gen: v5e
topology: v5e:2x2
jax: 0.10.0
libtpu: 0.0.40
codegen_flags: <defaults>
</compile_context>

<pallas_src>
import functools

import jax
import jax.numpy as jnp
from jax.experimental import pallas as pl
from jax.experimental.pallas import tpu as pltpu


_VMEM_BUDGET_BYTES = 40 * 1024 * 1024   # per-step working-set target (fits v7x 64 MiB)
_VMEM_LIMIT_BYTES = 48 * 1024 * 1024    # scoped VMEM limit handed to Mosaic


def _window_attn_kernel(x_ref, rpb_ref, mask_ref,
                        wq_ref, bq_ref, wk_ref, bk_ref, wv_ref, bv_ref,
                        wp_ref, bp_ref, o_ref, ctx_ref, *, num_heads, tokens):
    """Fused windowed MHSA for one block of windows.

    x_ref:    (BW, N*C) or (BW, N, C)   window tokens
    rpb_ref:  (H, N, N)  bf16           relative-position bias (grid-invariant)
    mask_ref: (1|BW, N, N) bf16         additive shifted-window mask (zeros if none)
    wq/wk/wv: (C, C)     bf16           per-projection weights, (in, out); scale folded in wq
    bq/bk/bv: (1, C)     f32            per-projection biases (scale folded in bq)
    wp_ref:   (C, C)     bf16           output projection weight, (in, out)
    bp_ref:   (1, C)     f32            output projection bias
    o_ref:    same layout as x_ref
    ctx_ref:  (BW*N, C)  bf16 VMEM scratch (per-head context written in place)
    """
    H = num_heads
    N = tokens
    if x_ref.ndim == 2:
        BW = x_ref.shape[0]
        C = x_ref.shape[1] // N
    else:
        BW, _, C = x_ref.shape
    D = C // H
    R = BW * N

    # Single cast to bf16 for the MXU (no f32 round-trip of the activations).
    x2d = x_ref[...].reshape(R, C).astype(jnp.bfloat16)

    def _proj(w_ref, b_ref):
        y = jnp.dot(x2d, w_ref[...], preferred_element_type=jnp.float32)
        return (y + b_ref[...]).astype(jnp.bfloat16)          # bf16 right after bias add

    q = _proj(wq_ref, bq_ref)                                  # (R, C), q-scale pre-folded
    k = _proj(wk_ref, bk_ref)
    v = _proj(wv_ref, bv_ref)

    mask_f32 = mask_ref[...].astype(jnp.float32)               # (1|BW, N, N), hoisted

    for h in range(H):                                         # static unroll over heads
        lo = h * D
        qh = q[:, lo:lo + D].reshape(BW, N, D)
        kh = k[:, lo:lo + D].reshape(BW, N, D)
        vh = v[:, lo:lo + D].reshape(BW, N, D)

        # scores + relative-position bias (+ mask), f32 accumulation
        s = jnp.einsum('bnd,bmd->bnm', qh, kh,
                       preferred_element_type=jnp.float32)     # (BW, N, N)
        s = s + rpb_ref[h].astype(jnp.float32)                 # (N, N) broadcast
        s = s + mask_f32                                       # (1|BW, N, N) broadcast

        # softmax in f32 (approx reciprocal on the EUP; free slot)
        m = jnp.max(s, axis=-1, keepdims=True)
        p = jnp.exp(s - m)
        l = jnp.sum(p, axis=-1, keepdims=True)
        attn = (p * pl.reciprocal(l, approx=True)).astype(jnp.bfloat16)

        ctxh = jnp.einsum('bnm,bmd->bnd', attn, vh,
                          preferred_element_type=jnp.float32)  # (BW, N, D)
        # per-head write into the shared context scratch (no concat / f32 liveness)
        ctx_ref[:, lo:lo + D] = ctxh.reshape(R, D).astype(jnp.bfloat16)

    # --- output projection ---
    out = jnp.dot(ctx_ref[...], wp_ref[...], preferred_element_type=jnp.float32)
    out = out + bp_ref[...]
    if o_ref.ndim == 2:
        o_ref[...] = out.reshape(BW, N * C).astype(o_ref.dtype)   # lane-dense store
    else:
        o_ref[...] = out.reshape(BW, N, C).astype(o_ref.dtype)


def _relative_position_index(window_size):
    """Replicates the PyTorch buffer construction."""
    coords_h = jnp.arange(window_size)
    coords_w = jnp.arange(window_size)
    coords = jnp.stack(jnp.meshgrid(coords_h, coords_w, indexing='ij'))   # (2,Wh,Ww)
    coords_flatten = coords.reshape(2, -1)                                # (2, N)
    rel = coords_flatten[:, :, None] - coords_flatten[:, None, :]         # (2, N, N)
    rel = rel.transpose(1, 2, 0)                                          # (N, N, 2)
    rel = rel.at[:, :, 0].add(window_size - 1)
    rel = rel.at[:, :, 1].add(window_size - 1)
    rel = rel.at[:, :, 0].multiply(2 * window_size - 1)
    return rel.sum(-1).astype(jnp.int32)                                  # (N, N)


def prepare_window_attention_params(params, window_size, num_heads, qk_scale=None):
    """One-time weight/bias prep (hoist out of the per-call path)."""
    C = params['proj_weight'].shape[0]
    N = window_size * window_size
    D = C // num_heads
    scale = qk_scale if qk_scale is not None else D ** (-0.5)
    wqkv = params['qkv_weight']                       # (3C, C) torch Linear (out, in)
    bqkv = params['qkv_bias']
    rpi = params['relative_position_index'].reshape(-1)
    rpb = jnp.take(params['relative_position_bias_table'], rpi, axis=0)   # (N*N, H)
    rpb = rpb.reshape(N, N, num_heads).transpose(2, 0, 1)                 # (H, N, N)
    return {
        # split projections, (in, out) layout, bf16 for the MXU; q-scale folded in
        'wq': (wqkv[0:C].T * scale).astype(jnp.bfloat16),
        'bq': (bqkv[0:C] * scale).reshape(1, C).astype(jnp.float32),
        'wk': wqkv[C:2 * C].T.astype(jnp.bfloat16),
        'bk': bqkv[C:2 * C].reshape(1, C).astype(jnp.float32),
        'wv': wqkv[2 * C:3 * C].T.astype(jnp.bfloat16),
        'bv': bqkv[2 * C:3 * C].reshape(1, C).astype(jnp.float32),
        'wp': params['proj_weight'].T.astype(jnp.bfloat16),
        'bp': params['proj_bias'].reshape(1, C).astype(jnp.float32),
        'rpb': rpb.astype(jnp.bfloat16),
    }


def _vmem_bytes(bw, N, C, H, masked, io_bytes):
    """Approximate per-step VMEM footprint (double-buffered I/O + intermediates)."""
    rows = bw * N
    total = 0
    total += 2 * bw * N * C * io_bytes                 # x block (double buffered)
    total += 2 * bw * N * C * io_bytes                 # out block
    total += 2 * H * N * N * 2                         # rpb bf16
    total += 2 * (bw if masked else 1) * N * N * 2     # mask bf16
    total += 2 * (4 * C * C * 2 + 4 * C * 4)           # weights bf16 + biases f32
    total += rows * C * 2                              # ctx scratch bf16
    total += 4 * rows * C * 2                          # x2d + q/k/v bf16
    total += rows * C * 4                              # proj output f32
    total += 3 * bw * N * N * 4                        # live per-head score/prob f32
    return total


def _choose_block_windows(B_, N, nW, fits, target_rows=1024, min_grid=4):
    """Pick windows-per-step: ~target_rows MXU rows, grid >= min_grid steps when
    possible (2 steps per TensorCore on v7x), block tiles the mask, fits VMEM,
    preferring blocks that divide B_ (no padded windows)."""
    hi = max(1, min(B_, target_rows // max(N, 1)))
    if B_ >= min_grid:
        hi = min(hi, max(1, B_ // min_grid))
    if nW > 1:
        hi = min(hi, nW)
    for require_divides_batch in (True, False):
        for bw in range(hi, 0, -1):
            if nW > 1 and nW % bw:
                continue
            if require_divides_batch and B_ % bw:
                continue
            if fits(bw):
                return bw
    return 1


def window_attention_forward(x, params, window_size, num_heads, mask=None, *,
                             block_windows=None, lane_dense_io=True):
    """Replicates WindowAttention.forward.

    x:    (B_, N, C) with N = window_size**2
    mask: (nW, N, N) additive mask or None
    params: raw PyTorch-style dict (qkv_weight/qkv_bias/proj_weight/proj_bias/
            relative_position_bias_table/relative_position_index) or the output
            of prepare_window_attention_params (preferred: prep once, reuse).
    """
    B_, N, C = x.shape
    assert N == window_size * window_size, "token count must equal window_size^2"
    H = num_heads
    assert C % H == 0

    prep = params if 'wq' in params else prepare_window_attention_params(
        params, window_size, num_heads)

    masked = mask is not None
    if masked:
        nW = mask.shape[0]
        assert B_ % nW == 0, "B_ must be a multiple of num_windows when masked"
        mask_in = mask.astype(jnp.bfloat16)
    else:
        nW = 1
        mask_in = jnp.zeros((1, N, N), jnp.bfloat16)

    io_bytes = jnp.dtype(x.dtype).itemsize

    def fits(bw):
        return _vmem_bytes(bw, N, C, H, masked, io_bytes) <= _VMEM_BUDGET_BYTES

    if block_windows is None:
        bw = _choose_block_windows(B_, N, nW if masked else 1, fits)
    else:
        bw = max(1, min(int(block_windows), B_))
        if masked:
            bw = min(bw, nW)
            while nW % bw:
                bw -= 1

    grid = -(-B_ // bw)
    b_pad = grid * bw
    x_in = x
    if b_pad != B_:
        x_in = jnp.concatenate(
            [x, jnp.zeros((b_pad - B_, N, C), dtype=x.dtype)], axis=0)

    if lane_dense_io:
        # Lane-dense slabs: last block dim N*C is a large multiple of 128.
        x_in = x_in.reshape(b_pad, N * C)
        x_spec = pl.BlockSpec((bw, N * C), lambda i: (i, 0))
        out_spec = pl.BlockSpec((bw, N * C), lambda i: (i, 0))
        out_shape = jax.ShapeDtypeStruct((b_pad, N * C), x.dtype)
    else:
        x_spec = pl.BlockSpec((bw, N, C), lambda i: (i, 0, 0))
        out_spec = pl.BlockSpec((bw, N, C), lambda i: (i, 0, 0))
        out_shape = jax.ShapeDtypeStruct((b_pad, N, C), x.dtype)

    if masked:
        mask_blocks = nW // bw
        mask_spec = pl.BlockSpec((bw, N, N), lambda i: (i % mask_blocks, 0, 0))
    else:
        mask_spec = pl.BlockSpec((1, N, N), lambda i: (0, 0, 0))

    const2 = lambda i: (0, 0)
    kernel = functools.partial(_window_attn_kernel, num_heads=H, tokens=N)

    out = pl.pallas_call(
        kernel,
        out_shape=out_shape,
        grid_spec=pltpu.PrefetchScalarGridSpec(
            num_scalar_prefetch=0,
            grid=(grid,),
            in_specs=[
                x_spec,
                pl.BlockSpec((H, N, N), lambda i: (0, 0, 0)),   # rpb, grid-invariant
                mask_spec,
                pl.BlockSpec((C, C), const2), pl.BlockSpec((1, C), const2),   # wq, bq
                pl.BlockSpec((C, C), const2), pl.BlockSpec((1, C), const2),   # wk, bk
                pl.BlockSpec((C, C), const2), pl.BlockSpec((1, C), const2),   # wv, bv
                pl.BlockSpec((C, C), const2), pl.BlockSpec((1, C), const2),   # wp, bp
            ],
            out_specs=out_spec,
            scratch_shapes=[pltpu.VMEM((bw * N, C), jnp.bfloat16)],
        ),
        compiler_params=pltpu.CompilerParams(
            dimension_semantics=("parallel",),
            vmem_limit_bytes=_VMEM_LIMIT_BYTES,
        ),
    )(x_in, prep['rpb'], mask_in,
      prep['wq'], prep['bq'], prep['wk'], prep['bk'],
      prep['wv'], prep['bv'], prep['wp'], prep['bp'])

    out = out[:B_]
    if lane_dense_io:
        out = out.reshape(B_, N, C)
    return out


def _reference_forward(x, params, window_size, num_heads, mask=None):
    """Pure-JAX f32 replica of the PyTorch forward."""
    B_, N, C = x.shape
    H = num_heads
    D = C // H
    scale = D ** (-0.5)
    qkv = jnp.einsum('bnc,oc->bno', x, params['qkv_weight']) + params['qkv_bias']
    qkv = qkv.reshape(B_, N, 3, H, D).transpose(2, 0, 3, 1, 4)
    q, k, v = qkv[0] * scale, qkv[1], qkv[2]
    attn = jnp.einsum('bhnd,bhmd->bhnm', q, k)
    rpi = params['relative_position_index'].reshape(-1)
    rpb = jnp.take(params['relative_position_bias_table'], rpi, axis=0)
    rpb = rpb.reshape(N, N, H).transpose(2, 0, 1)
    attn = attn + rpb[None]
    if mask is not None:
        nW = mask.shape[0]
        attn = attn.reshape(B_ // nW, nW, H, N, N) + mask[None, :, None]
        attn = attn.reshape(B_, H, N, N)
    attn = jax.nn.softmax(attn, axis=-1)
    out = jnp.einsum('bhnm,bhmd->bhnd', attn, v)
    out = out.transpose(0, 2, 1, 3).reshape(B_, N, C)
    return jnp.einsum('bnc,oc->bno', out, params['proj_weight']) + params['proj_bias']


if __name__ == "__main__":
    # window_size=8 -> N=64 tokens, dim=64, num_heads=2,
    # B=2 images of 16x16 -> nW=4 windows each -> B_=8.
    window_size, dim, num_heads = 8, 64, 2
    B, nW = 2, 4
    B_ = B * nW
    N = window_size * window_size

    key = jax.random.PRNGKey(0)
    kx, k1, k2, k3, k4, k5 = jax.random.split(key, 6)

    x = jax.random.normal(kx, (B_, N, dim), dtype=jnp.float32)
    params = {
        'qkv_weight': 0.05 * jax.random.normal(k1, (3 * dim, dim), jnp.float32),
        'qkv_bias': 0.01 * jax.random.normal(k2, (3 * dim,), jnp.float32),
        'proj_weight': 0.05 * jax.random.normal(k3, (dim, dim), jnp.float32),
        'proj_bias': 0.01 * jax.random.normal(k4, (dim,), jnp.float32),
        'relative_position_bias_table': 0.02 * jax.random.normal(
            k5, ((2 * window_size - 1) ** 2, num_heads), jnp.float32),
        'relative_position_index': _relative_position_index(window_size),
    }

    # shifted-window style mask (0 / -100)
    idx = jnp.arange(N)
    grp = idx // 16
    blocked = jnp.where(grp[:, None] == grp[None, :], 0.0, -100.0).astype(jnp.float32)
    mask = jnp.stack([jnp.zeros((N, N), jnp.float32), blocked,
                      jnp.zeros((N, N), jnp.float32), blocked], axis=0)   # (nW, N, N)

    # One-time weight prep (hoisted out of the per-call path).
    prep = prepare_window_attention_params(params, window_size, num_heads)

    def _run(lane_dense):
        o = window_attention_forward(x, prep, window_size, num_heads,
                                     mask=None, lane_dense_io=lane_dense)
        o = jax.block_until_ready(o)
        om = window_attention_forward(x, prep, window_size, num_heads,
                                      mask=mask, lane_dense_io=lane_dense)
        om = jax.block_until_ready(om)
        return o, om

    try:
        out, out_m = _run(lane_dense=True)
    except Exception:
        # Layout-fallback guard: the lane-dense path relies on minor-dim
        # reshapes in Mosaic; fall back to the (bw, N, C) blocked layout.
        out, out_m = _run(lane_dense=False)

    ref = _reference_forward(x, params, window_size, num_heads, mask=None)
    ref_m = _reference_forward(x, params, window_size, num_heads, mask=mask)

    assert out.shape == (B_, N, dim), out.shape
    err = float(jnp.max(jnp.abs(out - ref)))
    assert jnp.allclose(out, ref, atol=2e-2, rtol=2e-2), err
    err_m = float(jnp.max(jnp.abs(out_m - ref_m)))
    assert jnp.allclose(out_m, ref_m, atol=2e-2, rtol=2e-2), err_m

    print("KERNEL_OK")
</pallas_src>

<mosaic_0001>
module attributes {stable_mosaic.version = 11 : i64} {
  func.func @_window_attn_kernel(%arg0: i32, %arg1: memref<2x64x64xf32, #tpu.memory_space<vmem>>, %arg2: memref<2x64x64xbf16, #tpu.memory_space<vmem>>, %arg3: memref<1x64x64xbf16, #tpu.memory_space<vmem>>, %arg4: memref<64x64xbf16, #tpu.memory_space<vmem>>, %arg5: memref<1x64xf32, #tpu.memory_space<vmem>>, %arg6: memref<64x64xbf16, #tpu.memory_space<vmem>>, %arg7: memref<1x64xf32, #tpu.memory_space<vmem>>, %arg8: memref<64x64xbf16, #tpu.memory_space<vmem>>, %arg9: memref<1x64xf32, #tpu.memory_space<vmem>>, %arg10: memref<64x64xbf16, #tpu.memory_space<vmem>>, %arg11: memref<1x64xf32, #tpu.memory_space<vmem>>, %arg12: memref<2x64x64xf32, #tpu.memory_space<vmem>>, %arg13: memref<128x64xbf16, #tpu.memory_space<vmem>>) attributes {dimension_semantics = [#tpu.dimension_semantics<parallel>], iteration_bounds = array<i64: 4>, scalar_prefetch = 0 : i64, scratch_operands = 1 : i64, tpu.core_type = #tpu.core_type<tc>, window_params = [{transform_indices = @transform_0, window_bounds = array<i64: 2, 64, 64>}, {pipeline_mode = #tpu.pipeline_mode<synchronous>, transform_indices = @transform_1, window_bounds = array<i64: 2, 64, 64>}, {pipeline_mode = #tpu.pipeline_mode<synchronous>, transform_indices = @transform_2, window_bounds = array<i64: 1, 64, 64>}, {pipeline_mode = #tpu.pipeline_mode<synchronous>, transform_indices = @transform_3, window_bounds = array<i64: 64, 64>}, {pipeline_mode = #tpu.pipeline_mode<synchronous>, transform_indices = @transform_4, window_bounds = array<i64: 1, 64>}, {pipeline_mode = #tpu.pipeline_mode<synchronous>, transform_indices = @transform_5, window_bounds = array<i64: 64, 64>}, {pipeline_mode = #tpu.pipeline_mode<synchronous>, transform_indices = @transform_6, window_bounds = array<i64: 1, 64>}, {pipeline_mode = #tpu.pipeline_mode<synchronous>, transform_indices = @transform_7, window_bounds = array<i64: 64, 64>}, {pipeline_mode = #tpu.pipeline_mode<synchronous>, transform_indices = @transform_8, window_bounds = array<i64: 1, 64>}, {pipeline_mode = #tpu.pipeline_mode<synchronous>, transform_indices = @transform_9, window_bounds = array<i64: 64, 64>}, {pipeline_mode = #tpu.pipeline_mode<synchronous>, transform_indices = @transform_10, window_bounds = array<i64: 1, 64>}, {transform_indices = @transform_11, window_bounds = array<i64: 2, 64, 64>}]} {
    %c0 = arith.constant 0 : index
    %c0_0 = arith.constant 0 : index
    %c0_1 = arith.constant 0 : index
    %0 = vector.load %arg1[%c0, %c0_0, %c0_1] : memref<2x64x64xf32, #tpu.memory_space<vmem>>, vector<2x64x64xf32>
    %1 = vector.shape_cast %0 : vector<2x64x64xf32> to vector<128x64xf32>
    %2 = arith.truncf %1 : vector<128x64xf32> to vector<128x64xbf16>
    %c0_2 = arith.constant 0 : index
    %c0_3 = arith.constant 0 : index
    %3 = vector.load %arg4[%c0_2, %c0_3] : memref<64x64xbf16, #tpu.memory_space<vmem>>, vector<64x64xbf16>
    %cst = arith.constant dense<0.000000e+00> : vector<128x64xf32>
    %4 = tpu.matmul %2, %3, %cst {dimension_numbers = #tpu.dot_dimension_numbers<[1], [0], [0], [1], [0, 0, 1, 1], [], []>} : vector<128x64xbf16>, vector<64x64xbf16>, vector<128x64xf32> -> vector<128x64xf32>
    %c0_4 = arith.constant 0 : index
    %c0_5 = arith.constant 0 : index
    %5 = vector.load %arg5[%c0_4, %c0_5] : memref<1x64xf32, #tpu.memory_space<vmem>>, vector<1x64xf32>
    %6 = vector.broadcast %5 : vector<1x64xf32> to vector<128x64xf32>
    %7 = arith.addf %4, %6 : vector<128x64xf32>
    %8 = arith.truncf %7 : vector<128x64xf32> to vector<128x64xbf16>
    %c0_6 = arith.constant 0 : index
    %c0_7 = arith.constant 0 : index
    %9 = vector.load %arg6[%c0_6, %c0_7] : memref<64x64xbf16, #tpu.memory_space<vmem>>, vector<64x64xbf16>
    %cst_8 = arith.constant dense<0.000000e+00> : vector<128x64xf32>
    %10 = tpu.matmul %2, %9, %cst_8 {dimension_numbers = #tpu.dot_dimension_numbers<[1], [0], [0], [1], [0, 0, 1, 1], [], []>} : vector<128x64xbf16>, vector<64x64xbf16>, vector<128x64xf32> -> vector<128x64xf32>
    %c0_9 = arith.constant 0 : index
    %c0_10 = arith.constant 0 : index
    %11 = vector.load %arg7[%c0_9, %c0_10] : memref<1x64xf32, #tpu.memory_space<vmem>>, vector<1x64xf32>
    %12 = vector.broadcast %11 : vector<1x64xf32> to vector<128x64xf32>
    %13 = arith.addf %10, %12 : vector<128x64xf32>
    %14 = arith.truncf %13 : vector<128x64xf32> to vector<128x64xbf16>
    %c0_11 = arith.constant 0 : index
    %c0_12 = arith.constant 0 : index
    %15 = vector.load %arg8[%c0_11, %c0_12] : memref<64x64xbf16, #tpu.memory_space<vmem>>, vector<64x64xbf16>
    %cst_13 = arith.constant dense<0.000000e+00> : vector<128x64xf32>
    %16 = tpu.matmul %2, %15, %cst_13 {dimension_numbers = #tpu.dot_dimension_numbers<[1], [0], [0], [1], [0, 0, 1, 1], [], []>} : vector<128x64xbf16>, vector<64x64xbf16>, vector<128x64xf32> -> vector<128x64xf32>
    %c0_14 = arith.constant 0 : index
    %c0_15 = arith.constant 0 : index
    %17 = vector.load %arg9[%c0_14, %c0_15] : memref<1x64xf32, #tpu.memory_space<vmem>>, vector<1x64xf32>
    %18 = vector.broadcast %17 : vector<1x64xf32> to vector<128x64xf32>
    %19 = arith.addf %16, %18 : vector<128x64xf32>
    %20 = arith.truncf %19 : vector<128x64xf32> to vector<128x64xbf16>
    %c0_16 = arith.constant 0 : index
    %c0_17 = arith.constant 0 : index
    %c0_18 = arith.constant 0 : index
    %21 = vector.load %arg3[%c0_16, %c0_17, %c0_18] : memref<1x64x64xbf16, #tpu.memory_space<vmem>>, vector<1x64x64xbf16>
    %22 = arith.extf %21 : vector<1x64x64xbf16> to vector<1x64x64xf32>
    %23 = vector.extract_strided_slice %8 {offsets = [0, 0], sizes = [128, 32], strides = [1, 1]} : vector<128x64xbf16> to vector<128x32xbf16>
    %24 = vector.shape_cast %23 : vector<128x32xbf16> to vector<2x64x32xbf16>
    %25 = vector.extract_strided_slice %14 {offsets = [0, 0], sizes = [128, 32], strides = [1, 1]} : vector<128x64xbf16> to vector<128x32xbf16>
    %26 = vector.shape_cast %25 : vector<128x32xbf16> to vector<2x64x32xbf16>
    %27 = vector.extract_strided_slice %20 {offsets = [0, 0], sizes = [128, 32], strides = [1, 1]} : vector<128x64xbf16> to vector<128x32xbf16>
    %28 = vector.shape_cast %27 : vector<128x32xbf16> to vector<2x64x32xbf16>
    "tpu.trace_start"() <{level = 10 : i32, message = "bnd,bmd->bnm"}> : () -> ()
    %cst_19 = arith.constant dense<0.000000e+00> : vector<2x64x64xf32>
    %29 = tpu.matmul %24, %26, %cst_19 {dimension_numbers = #tpu.dot_dimension_numbers<[2], [2], [1], [1], [0, 0, 0, 1, 1, 1], [0], [0]>} : vector<2x64x32xbf16>, vector<2x64x32xbf16>, vector<2x64x64xf32> -> vector<2x64x64xf32>
    "tpu.trace_stop"() : () -> ()
    %c0_20 = arith.constant 0 : index
    %c0_21 = arith.constant 0 : index
    %c0_22 = arith.constant 0 : index
    %30 = vector.load %arg2[%c0_20, %c0_21, %c0_22] : memref<2x64x64xbf16, #tpu.memory_space<vmem>>, vector<1x64x64xbf16>
    %31 = vector.shape_cast %30 : vector<1x64x64xbf16> to vector<64x64xbf16>
    %32 = arith.extf %31 : vector<64x64xbf16> to vector<64x64xf32>
    %33 = vector.shape_cast %32 : vector<64x64xf32> to vector<1x64x64xf32>
    %34 = vector.broadcast %33 : vector<1x64x64xf32> to vector<2x64x64xf32>
    %35 = arith.addf %29, %34 : vector<2x64x64xf32>
    %36 = vector.broadcast %22 : vector<1x64x64xf32> to vector<2x64x64xf32>
    %37 = arith.addf %35, %36 : vector<2x64x64xf32>
    %cst_23 = arith.constant dense<0xFF800000> : vector<2x64xf32>
    %38 = vector.multi_reduction <maximumf>, %37, %cst_23 [2] : vector<2x64x64xf32> to vector<2x64xf32>
    %39 = vector.shape_cast %38 : vector<2x64xf32> to vector<2x64x1xf32>
    %40 = vector.broadcast %39 : vector<2x64x1xf32> to vector<2x64x64xf32>
    %41 = arith.subf %37, %40 : vector<2x64x64xf32>
    %42 = math.exp %41 : vector<2x64x64xf32>
    %cst_24 = arith.constant dense<0.000000e+00> : vector<2x64xf32>
    %43 = vector.multi_reduction <add>, %42, %cst_24 [2] : vector<2x64x64xf32> to vector<2x64xf32>
    %44 = vector.shape_cast %43 : vector<2x64xf32> to vector<2x64x1xf32>
    %45 = tpu.reciprocal %44 {approx = true} : vector<2x64x1xf32> -> vector<2x64x1xf32>
    %46 = vector.broadcast %45 : vector<2x64x1xf32> to vector<2x64x64xf32>
    %47 = arith.mulf %42, %46 : vector<2x64x64xf32>
    %48 = arith.truncf %47 : vector<2x64x64xf32> to vector<2x64x64xbf16>
    "tpu.trace_start"() <{level = 10 : i32, message = "bnm,bmd->bnd"}> : () -> ()
    %cst_25 = arith.constant dense<0.000000e+00> : vector<2x64x32xf32>
    %49 = tpu.matmul %48, %28, %cst_25 {dimension_numbers = #tpu.dot_dimension_numbers<[2], [1], [1], [2], [0, 0, 0, 1, 1, 2], [0], [0]>} : vector<2x64x64xbf16>, vector<2x64x32xbf16>, vector<2x64x32xf32> -> vector<2x64x32xf32>
    "tpu.trace_stop"() : () -> ()
    %50 = vector.shape_cast %49 : vector<2x64x32xf32> to vector<128x32xf32>
    %51 = arith.truncf %50 : vector<128x32xf32> to vector<128x32xbf16>
    %c0_26 = arith.constant 0 : index
    %c0_27 = arith.constant 0 : index
    %52 = vector.load %arg13[%c0_26, %c0_27] : memref<128x64xbf16, #tpu.memory_space<vmem>>, vector<128x32xbf16>
    tpu.vector_store %arg13[%c0_26, %c0_27], %51 {strides = array<i32>} : memref<128x64xbf16, #tpu.memory_space<vmem>>, vector<128x32xbf16>,
    %53 = vector.extract_strided_slice %8 {offsets = [0, 32], sizes = [128, 32], strides = [1, 1]} : vector<128x64xbf16> to vector<128x32xbf16>
    %54 = vector.shape_cast %53 : vector<128x32xbf16> to vector<2x64x32xbf16>
    %55 = vector.extract_strided_slice %14 {offsets = [0, 32], sizes = [128, 32], strides = [1, 1]} : vector<128x64xbf16> to vector<128x32xbf16>
    %56 = vector.shape_cast %55 : vector<128x32xbf16> to vector<2x64x32xbf16>
    %57 = vector.extract_strided_slice %20 {offsets = [0, 32], sizes = [128, 32], strides = [1, 1]} : vector<128x64xbf16> to vector<128x32xbf16>
    %58 = vector.shape_cast %57 : vector<128x32xbf16> to vector<2x64x32xbf16>
    "tpu.trace_start"() <{level = 10 : i32, message = "bnd,bmd->bnm"}> : () -> ()
    %cst_28 = arith.constant dense<0.000000e+00> : vector<2x64x64xf32>
    %59 = tpu.matmul %54, %56, %cst_28 {dimension_numbers = #tpu.dot_dimension_numbers<[2], [2], [1], [1], [0, 0, 0, 1, 1, 1], [0], [0]>} : vector<2x64x32xbf16>, vector<2x64x32xbf16>, vector<2x64x64xf32> -> vector<2x64x64xf32>
    "tpu.trace_stop"() : () -> ()
    %c1 = arith.constant 1 : index
    %c0_29 = arith.constant 0 : index
    %c0_30 = arith.constant 0 : index
    %60 = vector.load %arg2[%c1, %c0_29, %c0_30] : memref<2x64x64xbf16, #tpu.memory_space<vmem>>, vector<1x64x64xbf16>
    %61 = vector.shape_cast %60 : vector<1x64x64xbf16> to vector<64x64xbf16>
    %62 = arith.extf %61 : vector<64x64xbf16> to vector<64x64xf32>
    %63 = vector.shape_cast %62 : vector<64x64xf32> to vector<1x64x64xf32>
    %64 = vector.broadcast %63 : vector<1x64x64xf32> to vector<2x64x64xf32>
    %65 = arith.addf %59, %64 : vector<2x64x64xf32>
    %66 = vector.broadcast %22 : vector<1x64x64xf32> to vector<2x64x64xf32>
    %67 = arith.addf %65, %66 : vector<2x64x64xf32>
    %cst_31 = arith.constant dense<0xFF800000> : vector<2x64xf32>
    %68 = vector.multi_reduction <maximumf>, %67, %cst_31 [2] : vector<2x64x64xf32> to vector<2x64xf32>
    %69 = vector.shape_cast %68 : vector<2x64xf32> to vector<2x64x1xf32>
    %70 = vector.broadcast %69 : vector<2x64x1xf32> to vector<2x64x64xf32>
    %71 = arith.subf %67, %70 : vector<2x64x64xf32>
    %72 = math.exp %71 : vector<2x64x64xf32>
    %cst_32 = arith.constant dense<0.000000e+00> : vector<2x64xf32>
    %73 = vector.multi_reduction <add>, %72, %cst_32 [2] : vector<2x64x64xf32> to vector<2x64xf32>
    %74 = vector.shape_cast %73 : vector<2x64xf32> to vector<2x64x1xf32>
    %75 = tpu.reciprocal %74 {approx = true} : vector<2x64x1xf32> -> vector<2x64x1xf32>
    %76 = vector.broadcast %75 : vector<2x64x1xf32> to vector<2x64x64xf32>
    %77 = arith.mulf %72, %76 : vector<2x64x64xf32>
    %78 = arith.truncf %77 : vector<2x64x64xf32> to vector<2x64x64xbf16>
    "tpu.trace_start"() <{level = 10 : i32, message = "bnm,bmd->bnd"}> : () -> ()
    %cst_33 = arith.constant dense<0.000000e+00> : vector<2x64x32xf32>
    %79 = tpu.matmul %78, %58, %cst_33 {dimension_numbers = #tpu.dot_dimension_numbers<[2], [1], [1], [2], [0, 0, 0, 1, 1, 2], [0], [0]>} : vector<2x64x64xbf16>, vector<2x64x32xbf16>, vector<2x64x32xf32> -> vector<2x64x32xf32>
    "tpu.trace_stop"() : () -> ()
    %80 = vector.shape_cast %79 : vector<2x64x32xf32> to vector<128x32xf32>
    %81 = arith.truncf %80 : vector<128x32xf32> to vector<128x32xbf16>
    %c0_34 = arith.constant 0 : index
    %c32 = arith.constant 32 : index
    %82 = vector.load %arg13[%c0_34, %c32] : memref<128x64xbf16, #tpu.memory_space<vmem>>, vector<128x32xbf16>
    tpu.vector_store %arg13[%c0_34, %c32], %81 {strides = array<i32>} : memref<128x64xbf16, #tpu.memory_space<vmem>>, vector<128x32xbf16>,
    %c0_35 = arith.constant 0 : index
    %c0_36 = arith.constant 0 : index
    %83 = vector.load %arg13[%c0_35, %c0_36] : memref<128x64xbf16, #tpu.memory_space<vmem>>, vector<128x64xbf16>
    %c0_37 = arith.constant 0 : index
    %c0_38 = arith.constant 0 : index
    %84 = vector.load %arg10[%c0_37, %c0_38] : memref<64x64xbf16, #tpu.memory_space<vmem>>, vector<64x64xbf16>
    %cst_39 = arith.constant dense<0.000000e+00> : vector<128x64xf32>
    %85 = tpu.matmul %83, %84, %cst_39 {dimension_numbers = #tpu.dot_dimension_numbers<[1], [0], [0], [1], [0, 0, 1, 1], [], []>} : vector<128x64xbf16>, vector<64x64xbf16>, vector<128x64xf32> -> vector<128x64xf32>
    %c0_40 = arith.constant 0 : index
    %c0_41 = arith.constant 0 : index
    %86 = vector.load %arg11[%c0_40, %c0_41] : memref<1x64xf32, #tpu.memory_space<vmem>>, vector<1x64xf32>
    %87 = vector.broadcast %86 : vector<1x64xf32> to vector<128x64xf32>
    %88 = arith.addf %85, %87 : vector<128x64xf32>
    %89 = vector.shape_cast %88 : vector<128x64xf32> to vector<2x64x64xf32>
    %c0_42 = arith.constant 0 : index
    %c0_43 = arith.constant 0 : index
    %c0_44 = arith.constant 0 : index
    %90 = vector.load %arg12[%c0_42, %c0_43, %c0_44] : memref<2x64x64xf32, #tpu.memory_space<vmem>>, vector<2x64x64xf32>
    tpu.vector_store %arg12[%c0_42, %c0_43, %c0_44], %89 {strides = array<i32>} : memref<2x64x64xf32, #tpu.memory_space<vmem>>, vector<2x64x64xf32>,
    return
  }
  func.func @transform_0(%arg0: i32) -> (i32, i32, i32) {
    %c0_i32 = arith.constant 0 : i32
    %c0_i32_0 = arith.constant 0 : i32
    %c0_i32_1 = arith.constant 0 : i32
    return %arg0, %c0_i32, %c0_i32_0 : i32, i32, i32
  }
  func.func @transform_1(%arg0: i32) -> (i32, i32, i32) {
    %c0_i32 = arith.constant 0 : i32
    %c0_i32_0 = arith.constant 0 : i32
    %c0_i32_1 = arith.constant 0 : i32
    %c0_i32_2 = arith.constant 0 : i32
    return %c0_i32, %c0_i32_0, %c0_i32_1 : i32, i32, i32
  }
  func.func @transform_2(%arg0: i32) -> (i32, i32, i32) {
    %c0_i32 = arith.constant 0 : i32
    %c0_i32_0 = arith.constant 0 : i32
    %c0_i32_1 = arith.constant 0 : i32
    %c0_i32_2 = arith.constant 0 : i32
    return %c0_i32, %c0_i32_0, %c0_i32_1 : i32, i32, i32
  }
  func.func @transform_3(%arg0: i32) -> (i32, i32) {
    %c0_i32 = arith.constant 0 : i32
    %c0_i32_0 = arith.constant 0 : i32
    %c0_i32_1 = arith.constant 0 : i32
    return %c0_i32, %c0_i32_0 : i32, i32
  }
  func.func @transform_4(%arg0: i32) -> (i32, i32) {
    %c0_i32 = arith.constant 0 : i32
    %c0_i32_0 = arith.constant 0 : i32
    %c0_i32_1 = arith.constant 0 : i32
    return %c0_i32, %c0_i32_0 : i32, i32
  }
  func.func @transform_5(%arg0: i32) -> (i32, i32) {
    %c0_i32 = arith.constant 0 : i32
    %c0_i32_0 = arith.constant 0 : i32
    %c0_i32_1 = arith.constant 0 : i32
    return %c0_i32, %c0_i32_0 : i32, i32
  }
  func.func @transform_6(%arg0: i32) -> (i32, i32) {
    %c0_i32 = arith.constant 0 : i32
    %c0_i32_0 = arith.constant 0 : i32
    %c0_i32_1 = arith.constant 0 : i32
    return %c0_i32, %c0_i32_0 : i32, i32
  }
  func.func @transform_7(%arg0: i32) -> (i32, i32) {
    %c0_i32 = arith.constant 0 : i32
    %c0_i32_0 = arith.constant 0 : i32
    %c0_i32_1 = arith.constant 0 : i32
    return %c0_i32, %c0_i32_0 : i32, i32
  }
  func.func @transform_8(%arg0: i32) -> (i32, i32) {
    %c0_i32 = arith.constant 0 : i32
    %c0_i32_0 = arith.constant 0 : i32
    %c0_i32_1 = arith.constant 0 : i32
    return %c0_i32, %c0_i32_0 : i32, i32
  }
  func.func @transform_9(%arg0: i32) -> (i32, i32) {
    %c0_i32 = arith.constant 0 : i32
    %c0_i32_0 = arith.constant 0 : i32
    %c0_i32_1 = arith.constant 0 : i32
    return %c0_i32, %c0_i32_0 : i32, i32
  }
  func.func @transform_10(%arg0: i32) -> (i32, i32) {
    %c0_i32 = arith.constant 0 : i32
    %c0_i32_0 = arith.constant 0 : i32
    %c0_i32_1 = arith.constant 0 : i32
    return %c0_i32, %c0_i32_0 : i32, i32
  }
  func.func @transform_11(%arg0: i32) -> (i32, i32, i32) {
    %c0_i32 = arith.constant 0 : i32
    %c0_i32_0 = arith.constant 0 : i32
    %c0_i32_1 = arith.constant 0 : i32
    return %arg0, %c0_i32, %c0_i32_0 : i32, i32, i32
  }
}

</mosaic_0001>

<bundles_post_ra>
// kernel: tpu_custom_call.1
= control target key start
LH: loop header
LB: loop body
LE: loop exit
PB: predicated region body
PF: predicated region fallthrough
CT: control target
= control target key end

     0   :  { %s4354_s0 = inlined_call_operand.hbm [shape: f32[8,64,64], index: 0, kind: input, shape index: {}]   ;;  %s4355_s1 = inlined_call_operand.hbm [shape: bf16[2,64,64], index: 1, kind: input, shape index: {}]   ;;  %s4356_s2 = inlined_call_operand.hbm [shape: bf16[1,64,64], index: 2, kind: input, shape index: {}]   ;;  %s4357_s3 = inlined_call_operand.hbm [shape: bf16[64,64], index: 3, kind: input, shape index: {}]   ;;  %s4358_s4 = inlined_call_operand.vmem [shape: f32[1,64], index: 4, kind: input, shape index: {}]   ;;  %s4359_s5 = inlined_call_operand.hbm [shape: bf16[64,64], index: 5, kind: input, shape index: {}]   ;;  %s4360_s6 = inlined_call_operand.vmem [shape: f32[1,64], index: 6, kind: input, shape index: {}]   ;;  %s4361_s7 = inlined_call_operand.hbm [shape: bf16[64,64], index: 7, kind: input, shape index: {}]   ;;  %s4362_s8 = inlined_call_operand.vmem [shape: f32[1,64], index: 8, kind: input, shape index: {}]   ;;  %s4363_s9 = inlined_call_operand.hbm [shape: bf16[64,64], index: 9, kind: input, shape index: {}]   ;;  %s4364_s10 = inlined_call_operand.vmem [shape: f32[1,64], index: 10, kind: input, shape index: {}]   ;;  %s4365_s11 = inlined_call_operand.hbm [shape: f32[8,64,64], index: 11, kind: output, shape index: {}]  }
   0x1   :  { %4366 = sst [smem:[#allocation21_spill]] %s4355_s1 }
   0x2   :  { %4367 = sst [smem:[#allocation22_spill]] %s4356_s2 }
   0x3   :  { %4368 = sst [smem:[#allocation23_spill]] %s4357_s3 }
   0x4   :  { %4369 = sst [smem:[#allocation24_spill]] %s4359_s5 }
   0x5   :  { %4370 = sst [smem:[#allocation25_spill]] %s4361_s7 }
   0x6   :  { %4371 = sst [smem:[#allocation26_spill]] %s4363_s9 }
   0x7   :  { %16 = vsyncpa [#allocation4], 0 }
   0x8   :  { %18 = vsyncpa [#allocation4 + $0x1], 0 }
   0x9   :  { %19 = vsyncpa [#allocation7], 0 }
   0xa   :  { %20 = vsyncpa [#allocation10], 0 }
   0xb   :  { %21 = vsyncpa [#allocation13], 0 }
   0xc   :  { %22 = vsyncpa [#allocation5], 0 }
   0xd   :  { %24 = vsyncpa [#allocation5 + $0x1], 0  ;;  %s3314_s17 = smov 0   ;;  %s3316_s18 = smov 0  }
   0xe   :  { %s3318_s19 = smov 0   ;;  %s3320_s20 = smov 0  }
   0xf LB: > { %s4372_s1 = sld [smem:[#allocation21_spill]]  ;;  %s3338_s24 = sadd.s32 4294967295, %s3238_s20   ;;  %s3238_s20 = sphi %s3320_s20, %s4388_s20   ;;  %s3234_s19 = sphi %s3318_s19, %s4387_s19   ;;  %s3230_s18 = sphi %s3316_s18, %s4386_s18   ;;  %s3226_s17 = sphi %s3314_s17, %s4385_s17  }
  0x10   : > { %p2427_p0 = scmp.ge.s32.totalorder %s3238_s20, 1  ;;  %p51_p1 = scmp.eq.s32.totalorder %s3338_s24, 0 }
  0x11   : > { %p297_p2 = scmp.lt.s32.totalorder %s3238_s20, 5  ;;  %s3240_s26 = smov [#allocation6]  }
  0x12   : > { %s310_s27 = sshll.u32 %s3240_s26, 4  ;;  %s4374_s3 = sld [smem:[#allocation23_spill]]  ;;  %s311_s27 = int_to_ptr.vmem [resolvable:$true] %s310_s27 }
  0x13   : > { %p3343_p3 = pnand %p2427_p0, %p297_p2  ;;  %s4376_s7 = sld [smem:[#allocation25_spill]] }
  0x14   : > { %s3241_s16 = smov [#allocation9]   ;;  %s3242_s22 = smov 64  }
  0x15   : > { %s308_s23 = sshll.u32 %s4372_s1, 4  ;;  %p2731_p4 = pneg %p3343_p3  ;;  %s309_s23 = int_to_ptr.hbm [resolvable:$true] %s308_s23 }
  0x16   : > { %s338_s21 = sshll.u32 %s3241_s16, 4  ;;  %s3243_s26 = smov 4   ;;  %s339_s21 = int_to_ptr.vmem [resolvable:$true] %s338_s21 }
  0x17   : > { %p3354_p5 = pnand %p2731_p4, %p51_p1  ;;  %s4377_s2 = sld [smem:[#allocation22_spill]] }
  0x18   : > { %s336_s30 = sshll.u32 %s4374_s3, 4  ;;  %s3244_s14 = smov [#allocation12]   ;;  %s337_s30 = int_to_ptr.hbm [resolvable:$true] %s336_s30 }
  0x19   : > { %s370_s15 = sshll.u32 %s4376_s7, 4  ;;  %s372_s16 = sshll.u32 %s3244_s14, 4  ;;  %s371_s15 = int_to_ptr.hbm [resolvable:$true] %s370_s15  ;;  %s373_s16 = int_to_ptr.vmem [resolvable:$true] %s372_s16 }
  0x1a   : > { %2734 = dma.hbm_to_vmem [thread:$0]  (!%p3354_p5), %s309_s23, 1024, %s311_s27, [#allocation7], %s3242_s22, %s3242_s22, %s3243_s26  }
  0x1b   : > { %2740 = dma.hbm_to_vmem [thread:$0]  (!%p3354_p5), %s337_s30, 512, %s339_s21, [#allocation10], %s3242_s22, %s3242_s22, %s3243_s26  }
  0x1c   : > { %2746 = dma.hbm_to_vmem [thread:$0]  (!%p3354_p5), %s371_s15, 512, %s373_s16, [#allocation13], %s3242_s22, %s3242_s22, %s3243_s26  }
  0x1d   : > { %s322_s13 = sshll.u32 %s4377_s2, 4  ;;  %s3245_s23 = smov [#allocation8]   ;;  %s323_s13 = int_to_ptr.hbm [resolvable:$true] %s322_s13 }
  0x1e   : > { %s324_s27 = sshll.u32 %s3245_s23, 4  ;;  %s4378_s5 = sld [smem:[#allocation24_spill]]  ;;  %s325_s27 = int_to_ptr.vmem [resolvable:$true] %s324_s27 }
  0x1f   : > { %2737 = dma.hbm_to_vmem [thread:$0]  (!%p3354_p5), %s323_s13, 512, %s325_s27, [#allocation7], %s3242_s22, %s3242_s22, %s3243_s26  }
  0x20   : > { %s4379_s9 = sld [smem:[#allocation26_spill]]  ;;  %s3246_s14 = smov [#allocation11]  }
  0x21   : > { %s355_s1 = sshll.u32 %s3246_s14, 4  ;;  %s3247_s13 = smov [#allocation14]   ;;  %s356_s1 = int_to_ptr.vmem [resolvable:$true] %s355_s1 }
  0x22   : > { %s389_s16 = sshll.u32 %s3247_s13, 4  ;;  %s2426_s23 = sadd.s32 4294967294, %s3238_s20   ;;  %s390_s16 = int_to_ptr.vmem [resolvable:$true] %s389_s16 }
  0x23   : > { %s3402_s27 = sadd.s32 1, %s3238_s20   ;;  %s37_s28 = sadd.s32 1, %s3234_s19 }
  0x24   : > { %s353_s21 = sshll.u32 %s4378_s5, 4  ;;  %s34_s30 = ssub.s32 %s3238_s20, %s3402_s27  ;;  %s354_s21 = int_to_ptr.hbm [resolvable:$true] %s353_s21 }
  0x25   : > { %2743 = dma.hbm_to_vmem [thread:$0]  (!%p3354_p5), %s354_s21, 512, %s356_s1, [#allocation10], %s3242_s22, %s3242_s22, %s3243_s26  }
  0x26   : > { %s387_s29 = sshll.u32 %s4379_s9, 4  ;;  %p35_p6 = scmp.eq.s32.totalorder %s34_s30, 0  ;;  %s388_s29 = int_to_ptr.hbm [resolvable:$true] %s387_s29 }
  0x27   : > { %2749 = dma.hbm_to_vmem [thread:$0]  (!%p3354_p5), %s388_s29, 512, %s390_s16, [#allocation13], %s3242_s22, %s3242_s22, %s3243_s26  }
  0x28   : > { %p44_p7 = scmp.ne.s32.totalorder %s3234_s19, %s3230_s18  ;;  %p45_p8 = scmp.eq.s32.totalorder %s3238_s20, 0 }
  0x29   : > { %p50_p9 = scmp.ne.s32.totalorder %s3230_s18, %s3226_s17  ;;  %p284_p12 = scmp.eq.s32.totalorder %s3338_s24, 3 }
  0x2a   : > { %s3413_s21 = scalar_select %p35_p6, %s3234_s19, %s37_s28  }
  0x2b   : > { %p3415_p10 = por %p45_p8, %p44_p7  ;;  %p3421_p11 = por %p51_p1, %p50_p9 }
  0x2c   : > { %p290_p13 = scmp.eq.s32.totalorder %s2426_s23, 3  ;;  %p2764_p0 = scmp.lt.s32.totalorder %s3238_s20, 4 }
  0x2d   : > { %s406_s26 = sand.u32 1, %s3234_s19   ;;  %p3428_p2 = por %p284_p12, %p44_p7 }
  0x2e   : > { %p3432_p4 = por %p290_p13, %p50_p9  ;;  %s2435_s14 = sshll.u32 %s406_s26, 7 }
  0x2f   : > { %s2615_s1 = sshll.u32 %s3238_s20, 7  ;;  %s410_s28 = scalar_lea.vmem [#allocation3], %s2435_s14 }
  0x30   : > { %s416_s30 = scalar_lea.hbm %s4354_s0, %s2615_s1  ;;  %s419_s2 = sshll.u32 %s410_s28, 4  ;;  %s420_s2 = int_to_ptr.vmem [resolvable:$true] %s419_s2 }
  0x31   : > { %s417_s3 = sshll.u32 %s416_s30, 4  ;;  %p3442_p5 = pnand %p2764_p0, %p3415_p10  ;;  %s418_s3 = int_to_ptr.hbm [resolvable:$true] %s417_s3 }
  0x32   : > { %s407_s5 = scalar_lea.sflag [#allocation4], %s406_s26  ;;  %s3130_s7 = sshra.s32 %s418_s3, 4  ;;  %s3131_s7 = int_to_ptr.hbm [resolvable:$true] %s3130_s7 }
  0x33   : > { %s3132_s9 = scalar_lea.hbm %s3131_s7, 128  ;;  %p3134_p7 = pneg %p3442_p5 }
  0x34   : > { %p3133_p6 = scmp.ne.s32.totalorder %s3131_s7, %s3132_s9  ;;  %s3137_s13 = scalar_lea.hbm %s4354_s0, 512 }
  0x35   : > { %p3138_p10 = scmp.lt.s32.totalorder %s3131_s7, %s4354_s0  ;;  %p3139_p12 = scmp.lt.s32.totalorder %s3137_s13, %s3132_s9 }
  0x36   : > { %p3135_p8 = pnand %p3134_p7, %p3133_p6 }
  0x37   : > { %p3140_p13 = por %p3139_p12, %p3138_p10 }
  0x38   : > { %p3136_p9 = pneg %p3135_p8 }
  0x3a   : > { %p3141_p0 = pnand %p3140_p13, %p3136_p9 }
  0x3c   : > { %3144 = shalt.err (!%p3141_p0)
}
  0x3d   : > { %s3248_s26 = smov 128   ;;  %s3249_s30 = smov 8  }
  0x3e   : > { %2753 = dma.hbm_to_vmem [thread:$0]  (!%p3442_p5), %s418_s3, 2048, %s420_s2, %s407_s5, %s3248_s26, %s3248_s26, %s3249_s30  }
  0x3f   : > { %431 = sbr.rel (%p3343_p3) target bundleno = 1393 (0x571), region = 64  ;;  %s3459_s28 = sand.u32 (!%p3343_p3), 1, %s3230_s18  }
  0x40   : > { %s2440_s7 = sshll.u32 (!%p3343_p3), %s3459_s28, 7  ;;  %s434_s9 = scalar_lea.sflag (!%p3343_p3), [#allocation4], %s3459_s28 }
  0x41   : > { %s3465_s14 = scalar_lea.vmem (!%p3343_p3), [#allocation3], %s2440_s7 }
  0x44   : > { %3205 = dma.done.wait (%p3421_p11), %s434_s9, 2048  }
  0x45   : > { %3207 = vsyncadd (%p3421_p11), %s434_s9, 4294965248 }
  0x46   : > { %3209 = dma.done.wait (%p51_p1), [#allocation7], 1536  }
  0x47   : > { %3211 = vsyncadd (%p51_p1), [#allocation7], 4294965760 }
  0x48   : > { %3213 = dma.done.wait (%p51_p1), [#allocation10], 1024  }
  0x49   : > { %3215 = vsyncadd (%p51_p1), [#allocation10], 4294966272 }
  0x4a   : > { %3217 = dma.done.wait (%p51_p1), [#allocation13], 1024  }
  0x4b   : > { %3219 = vsyncadd (%p51_p1), [#allocation13], 4294966272  ;;  %v2623_v0 = vld [vmem:[#allocation11 + $0x18] sm:$0xff]  ;;  %v2622_v1 = vld [vmem:[#allocation11 + $0x10] sm:$0xff]  ;;  %vm570_vm0 = vcmask 523264   ;;  %s3250_s5 = smov 96  }
  0x4c   : > { %700 = vmatpush.bf16.msra.mxu1 %v2623_v0  ;;  %v2619_v2 = vld [vmem:[#allocation9 + $0x18] sm:$0xff]  ;;  %v2618_v3 = vld [vmem:[#allocation9 + $0x10] sm:$0xff]  ;;  %v2621_v4 = vld [vmem:[#allocation11 + $0x8] sm:$0xff]  ;;  %vm934_vm1 = vcmask 261120   ;;  %vm1475_vm2 = vcmask 257024   ;;  %s3251_s13 = smov 32  }
  0x4d   : > { %599 = vmatpush.bf16.msra.mxu0 %v2619_v2  ;;  %v2617_v5 = vld [vmem:[#allocation9 + $0x8] sm:$0xff]  ;;  %v2620_v6 = vld [vmem:[#allocation11] sm:$0xff]  ;;  %v512_v11 = vld [vmem:[%s3465_s14 + $0x10] sm:$0xff]  ;;  %vm2081_vm3 = vcmask 519424   ;;  %s4283_s26 = scalar_lea.vmem [#allocation15], %s2440_s7  ;;  %s2641_s30 = sshll.u32 %s3338_s24, 7 }
  0x4e   : > { %v510_v7 = vld [vmem:[%s3465_s14] sm:$0xff]  ;;  %v511_v8 = vld [vmem:[%s3465_s14 + $0x8] sm:$0xff]  ;;  %v513_v12 = vld [vmem:[%s3465_s14 + $0x18] sm:$0xff]  ;;  %s2293_s2 = sshll.u32 %s4283_s26, 4  ;;  %s3180_s1 = scalar_lea.hbm %s4365_s11, 512  ;;  %s2294_s2 = int_to_ptr.vmem [resolvable:$true] %s2293_s2 }
  0x4f   : > { %v526_v9 = vpack.c.bf16 %v511_v8, %v510_v7  ;;  %v2616_v10 = vld [vmem:[#allocation9] sm:$0xff]  ;;  %v527_v13 = vpack.c.bf16 %v513_v12, %v512_v11  ;;  %v2627_v14 = vld [vmem:[#allocation12 + $0x18] sm:$0xff]  ;;  %v2626_v15 = vld [vmem:[#allocation12 + $0x10] sm:$0xff] }
  0x50   : > { %701 = vmatpush.bf16.msra.mxu1 %v2622_v1  ;;  %801 = vmatpush.bf16.msra.mxu2 %v2627_v14  ;;  %v2625_v16 = vld [vmem:[#allocation12 + $0x8] sm:$0xff]  ;;  %v514_v17 = vld [vmem:[%s3465_s14 + $0x20] sm:$0xff]  ;;  %v516_v24 = vld [vmem:[%s3465_s14 + $0x30] sm:$0xff] }
  0x51   : > { %600 = vmatpush.bf16.msra.mxu0 %v2618_v3  ;;  %2699 = vmatpush.bf16.msra.mxu3 %v2627_v14  ;;  %v515_v18 = vld [vmem:[%s3465_s14 + $0x28] sm:$0xff]  ;;  %v2624_v19 = vld [vmem:[#allocation12] sm:$0xff]  ;;  %v517_v25 = vld [vmem:[%s3465_s14 + $0x38] sm:$0xff] }
  0x52   : > { %v518_v20 = vld [vmem:[%s3465_s14 + $0x40] sm:$0xff]  ;;  %v519_v21 = vld [vmem:[%s3465_s14 + $0x48] sm:$0xff]  ;;  %v528_v22 = vpack.c.bf16 %v515_v18, %v514_v17  ;;  %v520_v26 = vld [vmem:[%s3465_s14 + $0x50] sm:$0xff]  ;;  %v529_v28 = vpack.c.bf16 %v517_v25, %v516_v24 }
  0x53   : > { %v530_v23 = vpack.c.bf16 %v519_v21, %v518_v20  ;;  %v521_v27 = vld [vmem:[%s3465_s14 + $0x58] sm:$0xff]  ;;  %v522_v30 = vld [vmem:[%s3465_s14 + $0x60] sm:$0xff]  ;;  %v523_v31 = vld [vmem:[%s3465_s14 + $0x68] sm:$0xff] }
  0x54   : > { %702 = vmatpush.bf16.msra.mxu1 %v2621_v4  ;;  %802 = vmatpush.bf16.msra.mxu2 %v2626_v15  ;;  %v531_v29 = vpack.c.bf16 %v521_v27, %v520_v26  ;;  %v532_v32 = vpack.c.bf16 %v523_v31, %v522_v30  ;;  %v524_v33 = vld [vmem:[%s3465_s14 + $0x70] sm:$0xff]  ;;  %v525_v34 = vld [vmem:[%s3465_s14 + $0x78] sm:$0xff]  ;;  %v3526_v41 = vld [vmem:[%s4360_s6] ss:$0 sm:$0xff]  ;;  %s2292_s14 = scalar_lea.hbm %s4365_s11, %s2641_s30 }
  0x55   : > { %601 = vmatpush.bf16.msra.mxu0 %v2617_v5  ;;  %2700 = vmatpush.bf16.msra.mxu3 %v2626_v15  ;;  %v533_v35 = vpack.c.bf16 %v525_v34, %v524_v33  ;;  %v3541_v61 = vld [vmem:[%s4358_s4] ss:$0 sm:$0xff]  ;;  %s2295_s3 = sshll.u32 %s2292_s14, 4  ;;  %s2296_s3 = int_to_ptr.hbm [resolvable:$true] %s2295_s3 }
  0x56   : > { %s3174_s25 = sshra.s32 %s2296_s3, 4  ;;  %s3175_s25 = int_to_ptr.hbm [resolvable:$true] %s3174_s25 }
  0x57   : > { %s3176_s24 = scalar_lea.hbm %s3175_s25, 128  ;;  %p3181_p5 = scmp.lt.s32.totalorder %s3175_s25, %s4365_s11 }
  0x58   : > { %703 = vmatpush.bf16.msra.mxu1 %v2620_v6  ;;  %803 = vmatpush.bf16.msra.mxu2 %v2625_v16  ;;  %p3177_p1 = scmp.ne.s32.totalorder %s3175_s25, %s3176_s24  ;;  %p3182_p6 = scmp.lt.s32.totalorder %s3180_s1, %s3176_s24 }
  0x59   : > { %602 = vmatpush.bf16.msra.mxu0 %v2616_v10  ;;  %2701 = vmatpush.bf16.msra.mxu3 %v2625_v16 }
  0x5a   : > { %p3178_p3 = pnand %p3177_p1, %p3428_p2  ;;  %p3183_p7 = por %p3182_p6, %p3181_p5 }
  0x5b   : > { %2488 = vmatmul.msk.bf16.vlgmr.msra.gmra.mxu1 %vm570_vm0, %v526_v9 }
  0x5c   : > { %2464 = vmatmul.msk.bf16.vlgmr.msra.gmra.mxu0 %vm570_vm0, %v526_v9  ;;  %804 = vmatpush.bf16.msra.mxu2 %v2624_v19  ;;  %p3179_p11 = pneg %p3178_p3 }
  0x5d   : > { %2702 = vmatpush.bf16.msra.mxu3 %v2624_v19 }
  0x5e   : > { %p3184_p8 = pnand %p3183_p7, %p3179_p11 }
  0x5f   : > { %2512 = vmatmul.msk.bf16.vlgmr.msra.gmra.mxu2 %vm570_vm0, %v526_v9 }
  0x60   : > { %2516 = vmatmul.msk.bf16.vlgmr.msra.gmra.mxu3 %vm570_vm0, %v530_v23 }
  0x6b   : > { %2489 = vmatmul.msk.bf16.gmra.mxu1 %vm570_vm0, %v527_v13 }
  0x6c   : > { %2465 = vmatmul.msk.bf16.gmra.mxu0 %vm570_vm0, %v527_v13 }
  0x6f   : > { %2513 = vmatmul.msk.bf16.gmra.mxu2 %vm570_vm0, %v527_v13 }
  0x70   : > { %2517 = vmatmul.msk.bf16.gmra.mxu3 %vm570_vm0, %v531_v29 }
  0x7b   : > { %2490 = vmatmul.msk.bf16.gmra.mxu1 %vm570_vm0, %v528_v22 }
  0x7c   : > { %2466 = vmatmul.msk.bf16.gmra.mxu0 %vm570_vm0, %v528_v22 }
  0x7f   : > { %2514 = vmatmul.msk.bf16.gmra.mxu2 %vm570_vm0, %v528_v22 }
  0x80   : > { %2518 = vmatmul.msk.bf16.gmra.mxu3 %vm570_vm0, %v532_v32 }
  0x8b   : > { %2491 = vmatmul.msk.bf16.gmra.mxu1 %vm570_vm0, %v529_v28 }
  0x8c   : > { %2467 = vmatmul.msk.bf16.gmra.mxu0 %vm570_vm0, %v529_v28 }
  0x8f   : > { %2515 = vmatmul.msk.bf16.gmra.mxu2 %vm570_vm0, %v529_v28 }
  0x90   : > { %2519 = vmatmul.msk.bf16.gmra.mxu3 %vm570_vm0, %v533_v35 }
  0x9b   : > { %2492 = vmatmul.msk.bf16.gmra.mxu1 %vm570_vm0, %v530_v23 }
  0x9c   : > { %2468 = vmatmul.msk.bf16.gmra.mxu0 %vm570_vm0, %v530_v23 }
  0xab   : > { %2493 = vmatmul.msk.bf16.gmra.mxu1 %vm570_vm0, %v531_v29 }
  0xac   : > { %2469 = vmatmul.msk.bf16.gmra.mxu0 %vm570_vm0, %v531_v29 }
  0xbb   : > { %2494 = vmatmul.msk.bf16.gmra.mxu1 %vm570_vm0, %v532_v32 }
  0xbc   : > { %2470 = vmatmul.msk.bf16.gmra.mxu0 %vm570_vm0, %v532_v32 }
  0xcb   : > { %2495 = vmatmul.msk.bf16.gmra.mxu1 %vm570_vm0, %v533_v35 }
  0xcc   : > { %2471 = vmatmul.msk.bf16.gmra.mxu0 %vm570_vm0, %v533_v35 }
  0xd8   : > { %v705_v36 = vpop.f32.mrf.mxu1 }
  0xd9   : > { %v604_v37 = vpop.f32.mrf.mxu0  ;;  %v706_v50 = vadd.f32 %v3526_v41, %v705_v36 }
  0xda   : > { %v605_v0 = vadd.f32 %v3541_v61, %v604_v37 }
  0xdb   : > { %v745_v56 = vpack.c.bf16 %v706_v50, %v706_v50 }
  0xdc   : > { %v644_v4 = vpack.c.bf16 %v605_v0, %v605_v0 }
  0xdd   : > { %v922_v60 = vunpack.c.l.b16 %v745_v56 }
  0xde   : > { %v902_v7 = vunpack.c.l.b16 %v644_v4 }
  0xe0   : > { %v707_v38 = vpop.f32.mrf.mxu1 }
  0xe1   : > { %v606_v39 = vpop.f32.mrf.mxu0  ;;  %v708_v47 = vadd.f32 %v3526_v41, %v707_v38 }
  0xe2   : > { %v3536_v59 = vpop.f32.mrf.mxu2  ;;  %v607_v1 = vadd.f32 %v3541_v61, %v606_v39 }
  0xe3   : > { %v746_v53 = vpack.c.bf16 %v708_v47, %v708_v47  ;;  %v3569_v37 = vpop.f32.mrf.mxu3 }
  0xe4   : > { %v645_v5 = vpack.c.bf16 %v607_v1, %v607_v1 }
  0xe5   : > { %v923_v57 = vunpack.c.l.b16 %v746_v53 }
  0xe6   : > { %v903_v8 = vunpack.c.l.b16 %v645_v5 }
  0xe7   : > { %v3543_v62 = vpack.c.b16 %v923_v57, %v922_v60 }
  0xe8   : > { %v710_v40 = vpop.f32.mrf.mxu1  ;;  %v3554_v12 = vpack.c.b16 %v903_v8, %v902_v7 }
  0xe9   : > { %v609_v42 = vpop.f32.mrf.mxu0  ;;  %v711_v43 = vadd.f32 %v3526_v41, %v710_v40 }
  0xea   : > { %v3549_v3 = vpop.f32.mrf.mxu2  ;;  %1509 = vrot.lane.b32.xlu2 %v3554_v12, %s3250_s5  ;;  %v610_v14 = vadd.f32 %v3541_v61, %v609_v42 }
  0xeb   : > { %v747_v45 = vpack.c.bf16 %v711_v43, %v711_v43  ;;  %v3581_v47 = vpop.f32.mrf.mxu3 }
  0xec   : > { %v646_v22 = vpack.c.bf16 %v610_v14, %v610_v14 }
  0xed   : > { %v924_v51 = vunpack.c.l.b16 %v747_v45 }
  0xee   : > { %v904_v32 = vunpack.c.l.b16 %v646_v22 }
  0xf0   : > { %v712_v44 = vpop.f32.mrf.mxu1 }
  0xf1   : > { %v713_v46 = vadd.f32 %v3526_v41, %v712_v44  ;;  %v611_v49 = vpop.f32.mrf.mxu0 }
  0xf2   : > { %v3551_v10 = vpop.f32.mrf.mxu2  ;;  %v612_v18 = vadd.f32 %v3541_v61, %v611_v49 }
  0xf3   : > { %v748_v48 = vpack.c.bf16 %v713_v46, %v713_v46  ;;  %v3591_v60 = vpop.f32.mrf.mxu3 }
  0xf4   : > { %v647_v27 = vpack.c.bf16 %v612_v18, %v612_v18 }
  0xf5   : > { %v925_v52 = vunpack.c.l.b16 %v748_v48 }
  0xf6   : > { %v905_v34 = vunpack.c.l.b16 %v647_v27 }
  0xf7   : > { %v3532_v54 = vpack.c.b16 %v925_v52, %v924_v51 }
  0xf8   : > { %v715_v55 = vpop.f32.mrf.mxu1  ;;  %v3571_v40 = vpack.c.b16 %v905_v34, %v904_v32 }
  0xf9   : > { %1519 = vrot.lane.b32.xlu1 %v3532_v54, %s3250_s5  ;;  %v614_v58 = vpop.f32.mrf.mxu0  ;;  %v716_v19 = vadd.f32 %v3526_v41, %v715_v55  ;;  %v951_v53 = vsel %vm934_vm1, %v3532_v54, 0  ;;  %v3602_v54 = vld [vmem:[%s4362_s8] ss:$0 sm:$0xff] }
  0xfa   : > { %v3563_v23 = vpop.f32.mrf.mxu2  ;;  %1511 = vrot.lane.b32.xlu2 %v3571_v40, %s3250_s5  ;;  %v615_v44 = vadd.f32 %v3541_v61, %v614_v58  ;;  %v809_v32 = vadd.f32 %v3602_v54, %v3549_v3 }
  0xfb   : > { %v749_v28 = vpack.c.bf16 %v716_v19, %v716_v19 }
  0xfc   : > { %v648_v49 = vpack.c.bf16 %v615_v44, %v615_v44 }
  0xfd   : > { %v926_v35 = vunpack.c.l.b16 %v749_v28 }
  0xfe   : > { %v906_v52 = vunpack.c.l.b16 %v648_v49 }
 0x100   : > { %v717_v63 = vpop.f32.mrf.mxu1 }
 0x101   : > { %1517 = vrot.lane.b32.xlu1 %v3543_v62, %s3250_s5  ;;  %v616_v2 = vpop.f32.mrf.mxu0  ;;  %v718_v15 = vadd.f32 %v3526_v41, %v717_v63 }
 0x102   : > { %v816_v38 = vpop.f32.mrf.mxu2  ;;  %v617_v45 = vadd.f32 %v3541_v61, %v616_v2  ;;  %v948_v2 = vsel %vm934_vm1, %v3543_v62, 0 }
 0x103   : > { %v750_v24 = vpack.c.bf16 %v718_v15, %v718_v15  ;;  %v3613_v15 = vpop.f32.mrf.mxu3 }
 0x104   : > { %v649_v50 = vpack.c.bf16 %v617_v45, %v617_v45  ;;  %v847_v45 = vpack.c.bf16 %v809_v32, %v809_v32 }
 0x105   : > { %v927_v31 = vunpack.c.l.b16 %v750_v24 }
 0x106   : > { %v907_v55 = vunpack.c.l.b16 %v649_v50 }
 0x107   : > { %v932_v39 = vpack.c.b16 %v927_v31, %v926_v35 }
 0x108   : > { %v720_v6 = vpop.f32.mrf.mxu1  ;;  %v3589_v58 = vpack.c.b16 %v907_v55, %v906_v52 }
 0x109   : > { %v619_v9 = vpop.f32.mrf.mxu0  ;;  %v721_v11 = vadd.f32 %v3526_v41, %v720_v6  ;;  %v954_v43 = vsel %vm934_vm1, %v932_v39, 0 }
 0x10a   : > { %v818_v48 = vpop.f32.mrf.mxu2  ;;  %v620_v63 = vadd.f32 %v3541_v61, %v619_v9 }
 0x10b   : > { %v751_v16 = vpack.c.bf16 %v721_v11, %v721_v11  ;;  %v817_v11 = vadd.f32 %v3602_v54, %v816_v38  ;;  %v819_v18 = vadd.f32 %v3602_v54, %v818_v48  ;;  %v3631_v44 = vpop.f32.mrf.mxu3 }
 0x10c   : > { %v650_v4 = vpack.c.bf16 %v620_v63, %v620_v63 }
 0x10d   : > { %v928_v25 = vunpack.c.l.b16 %v751_v16  ;;  %v851_v27 = vpack.c.bf16 %v819_v18, %v819_v18 }
 0x10e   : > { %v908_v16 = vunpack.c.l.b16 %v650_v4 }
 0x10f   : > { %v1322_v38 = vunpack.c.l.b16 %v851_v27 }
 0x110   : > { %v722_v13 = vpop.f32.mrf.mxu1 }
 0x111   : > { %v723_v17 = vadd.f32 %v3526_v41, %v722_v13  ;;  %v621_v21 = vpop.f32.mrf.mxu0 }
 0x112   : > { %v821_v57 = vpop.f32.mrf.mxu2  ;;  %v622_v0 = vadd.f32 %v3541_v61, %v621_v21  ;;  %v814_v21 = vadd.f32 %v3602_v54, %v3563_v23 }
 0x113   : > { %v752_v20 = vpack.c.bf16 %v723_v17, %v723_v17  ;;  %v822_v13 = vadd.f32 %v3602_v54, %v821_v57  ;;  %v812_v17 = vadd.f32 %v3602_v54, %v3551_v10  ;;  %v807_v10 = vadd.f32 %v3602_v54, %v3536_v59 }
 0x114   : > { %v651_v5 = vpack.c.bf16 %v622_v0, %v622_v0  ;;  %v849_v23 = vpack.c.bf16 %v814_v21, %v814_v21 }
 0x115   : > { %v929_v26 = vunpack.c.l.b16 %v752_v20  ;;  %v852_v19 = vpack.c.bf16 %v822_v13, %v822_v13  ;;  %v846_v59 = vpack.c.bf16 %v807_v10, %v807_v10 }
 0x116   : > { %v909_v62 = vunpack.c.l.b16 %v651_v5  ;;  %v1320_v52 = vunpack.c.l.b16 %v849_v23 }
 0x117   : > { %v933_v29 = vpack.c.b16 %v929_v26, %v928_v25  ;;  %v850_v26 = vpack.c.bf16 %v817_v11, %v817_v11  ;;  %v1323_v28 = vunpack.c.l.b16 %v852_v19  ;;  %v1317_v0 = vunpack.c.l.b16 %v846_v59 }
 0x118   : > { %v3565_v30 = vpop.f32.mrf.mxu1  ;;  %v832_v59 = vadd.f32 %v3602_v54, %v3591_v60 }
 0x119   : > { %1523 = vrot.lane.b32.xlu0 %v933_v29, %s3250_s5  ;;  %v957_v33 = vsel %vm934_vm1, %v933_v29, 0  ;;  %v624_v36 = vpop.f32.mrf.mxu0  ;;  %v3622_v29 = vpack.c.b16 %v909_v62, %v908_v16  ;;  %v726_v63 = vadd.f32 %v3526_v41, %v3565_v30 }
 0x11a   : > { %963 = vmatpush.bf16.xpose.msrb.mxu3 %v957_v33  ;;  %v625_v7 = vadd.f32 %v3541_v61, %v624_v36  ;;  %v823_v9 = vpop.f32.mrf.mxu2  ;;  %v848_v33 = vpack.c.bf16 %v812_v17, %v812_v17  ;;  %v1321_v36 = vunpack.c.l.b16 %v850_v26 }
 0x11b   : > { %v824_v14 = vadd.f32 %v3602_v54, %v823_v9 }
 0x11c   : > { %v652_v22 = vpack.c.bf16 %v625_v7, %v625_v7 }
 0x11d   : > { %v853_v25 = vpack.c.bf16 %v824_v14, %v824_v14  ;;  %v753_v14 = vpack.c.bf16 %v726_v63, %v726_v63  ;;  %v856_v63 = vpack.c.bf16 %v832_v59, %v832_v59 }
 0x11e   : > { %v996_v34 = vunpack.c.l.b16 %v652_v22 }
 0x11f   : > { %v1324_v31 = vunpack.c.l.b16 %v853_v25  ;;  %v1016_v18 = vunpack.c.l.b16 %v753_v14  ;;  %v1404_v14 = vunpack.c.l.b16 %v856_v63 }
 0x120   : > { %v3575_v42 = vpop.f32.mrf.mxu1 }
 0x121   : > { %1521 = vrot.lane.b32.xlu0 %v932_v39, %s3250_s5  ;;  %v626_v46 = vpop.f32.mrf.mxu0  ;;  %v728_v55 = vadd.f32 %v3526_v41, %v3575_v42 }
 0x122   : > { %964 = vmatpush.bf16.xpose.msrb.mxu3 %v954_v43  ;;  %v627_v8 = vadd.f32 %v3541_v61, %v626_v46  ;;  %v1328_v43 = vpack.c.b16 %v1324_v31, %v1323_v28  ;;  %v1319_v46 = vunpack.c.l.b16 %v848_v33 }
 0x123   : > { %v754_v9 = vpack.c.bf16 %v728_v55, %v728_v55 }
 0x124   : > { %v653_v24 = vpack.c.bf16 %v627_v8, %v627_v8  ;;  %1349 = vmatpush.bf16.msrb.mxu0 %v1328_v43  ;;  %v3645_v7 = vpack.c.b16 %v1320_v52, %v1319_v46  ;;  %v838_v8 = vpop.f32.mrf.mxu3 }
 0x125   : > { %v1017_v17 = vunpack.c.l.b16 %v754_v9  ;;  %v839_v60 = vadd.f32 %v3602_v54, %v838_v8 }
 0x126   : > { %v997_v35 = vunpack.c.l.b16 %v653_v24 }
 0x127   : > { %v3661_v24 = vpack.c.b16 %v1017_v17, %v1016_v18 }
 0x128   : > { %v3583_v51 = vpop.f32.mrf.mxu1  ;;  %v3633_v48 = vpack.c.b16 %v997_v35, %v996_v34 }
 0x129   : > { %v3587_v56 = vpop.f32.mrf.mxu0  ;;  %1513 = vrot.lane.b32.xlu0 %v3589_v58, %s3250_s5  ;;  %v731_v27 = vadd.f32 %v3526_v41, %v3583_v51 }
 0x12a   : > { %965 = vmatpush.bf16.xpose.msrb.mxu3 %v951_v53  ;;  %v3636_v53 = vpack.c.b16 %v1322_v38, %v1321_v36  ;;  %v630_v51 = vadd.f32 %v3541_v61, %v3587_v56  ;;  %v837_v56 = vadd.f32 %v3602_v54, %v3631_v44 }
 0x12b   : > { %v755_v35 = vpack.c.bf16 %v731_v27, %v731_v27 }
 0x12c   : > { %1350 = vmatpush.bf16.msrb.mxu0 %v3636_v53  ;;  %v858_v55 = vpack.c.bf16 %v837_v56, %v837_v56 }
 0x130   : > { %v3597_v1 = vpop.f32.mrf.mxu1  ;;  %1351 = vmatpush.bf16.msrb.mxu0 %v3645_v7 }
 0x131   : > { %v3606_v6 = vpop.f32.mrf.mxu0  ;;  %1515 = vrot.lane.b32.xlu0 %v3622_v29, %s3250_s5  ;;  %v733_v10 = vadd.f32 %v3526_v41, %v3597_v1 }
 0x132   : > { %966 = vmatpush.bf16.xpose.msrb.mxu3 %v948_v2  ;;  %v1318_v2 = vunpack.c.l.b16 %v847_v45 }
 0x134   : > { %v3654_v30 = vpack.c.b16 %v1318_v2, %v1317_v0  ;;  %v654_v2 = vpack.c.bf16 %v630_v51, %v630_v51 }
 0x136   : > { %1352 = vmatpush.bf16.msrb.mxu0 %v3654_v30 }
 0x138   : > { %v735_v20 = vpop.f32.mrf.mxu1 }
 0x139   : > { %2520 = vmatmul.msk.bf16.vlgmr.msrb.gmra.mxu3 %vm934_vm1, %v3554_v12  ;;  %v736_v12 = vadd.f32 %v3526_v41, %v735_v20  ;;  %v634_v39 = vpop.f32.mrf.mxu0  ;;  %1578 = vrot.lane.b32.xlu0 %v3633_v48, %s3250_s5  ;;  %v841_v20 = vpop.f32.mrf.mxu3 }
 0x13a   : > { %v635_v16 = vadd.f32 %v3541_v61, %v634_v39  ;;  %v842_v36 = vadd.f32 %v3602_v54, %v841_v20  ;;  %v756_v39 = vpack.c.bf16 %v733_v10, %v733_v10 }
 0x13b   : > { %v757_v49 = vpack.c.bf16 %v736_v12, %v736_v12 }
 0x13c   : > { %v656_v21 = vpack.c.bf16 %v635_v16, %v635_v16  ;;  %v860_v1 = vpack.c.bf16 %v842_v36, %v842_v36  ;;  %v1019_v52 = vunpack.c.l.b16 %v756_v39 }
 0x13d   : > { %v1020_v4 = vunpack.c.l.b16 %v757_v49  ;;  %v1018_v49 = vunpack.c.l.b16 %v755_v35 }
 0x13e   : > { %v1000_v28 = vunpack.c.l.b16 %v656_v21 }
 0x13f   : > { %v1025_v9 = vpack.c.b16 %v1019_v52, %v1018_v49  ;;  %v3756_v52 = vld [vmem:[#allocation6 + $0x8] sm:$0xff]  }
 0x140   : > { %v737_v3 = vpop.f32.mrf.mxu1 }
 0x141   : > { %v738_v50 = vadd.f32 %v3526_v41, %v737_v3  ;;  %v636_v42 = vpop.f32.mrf.mxu0  ;;  %1881 = vrot.lane.b32.xlu0 %v1328_v43, %s3250_s5  ;;  %v843_v34 = vpop.f32.mrf.mxu3  ;;  %v632_v3 = vadd.f32 %v3541_v61, %v3606_v6  ;;  %v829_v6 = vadd.f32 %v3602_v54, %v3581_v47 }
 0x142   : > { %v637_v62 = vadd.f32 %v3541_v61, %v636_v42  ;;  %v844_v38 = vadd.f32 %v3602_v54, %v843_v34 }
 0x143   : > { %v758_v57 = vpack.c.bf16 %v738_v50, %v738_v50 }
 0x144   : > { %v657_v22 = vpack.c.bf16 %v637_v62, %v637_v62  ;;  %v861_v45 = vpack.c.bf16 %v844_v38, %v844_v38  ;;  %v998_v62 = vunpack.c.l.b16 %v654_v2  ;;  %v1510_v35 = vpop.permute.xlu2 %1509  ;;  %v3736_v38 = vld [vmem:[#allocation6] sm:$0xff]  }
 0x145   : > { %v1021_v5 = vunpack.c.l.b16 %v758_v57  ;;  %v859_v57 = vpack.c.bf16 %v839_v60, %v839_v60  ;;  %v2661_v56 = vunpack.c.h.bf16 %v3736_v38 }
 0x146   : > { %v1001_v31 = vunpack.c.l.b16 %v657_v22  ;;  %v1409_v50 = vunpack.c.l.b16 %v861_v45 }
 0x147   : > { %v3647_v11 = vpack.c.b16 %v1021_v5, %v1020_v4  ;;  %v655_v4 = vpack.c.bf16 %v632_v3, %v632_v3  ;;  %v1406_v5 = vunpack.c.l.b16 %v858_v55  ;;  %v1407_v8 = vunpack.c.l.b16 %v859_v57  ;;  %v2690_v55 = vld [vmem:[#allocation8 + $0x8] sm:$0xff]  }
 0x148   : > { %v740_v13 = vpop.f32.mrf.mxu1  ;;  %v3670_v12 = vpack.c.b16 %v1001_v31, %v1000_v28 }
 0x149   : > { %1590 = vrot.lane.b32.xlu2 %v3647_v11, %s3250_s5  ;;  %2521 = vmatmul.msk.bf16.gmra.mxu3 %vm934_vm1, %v3571_v40  ;;  %v741_v19 = vadd.f32 %v3526_v41, %v740_v13  ;;  %v855_v13 = vpack.c.bf16 %v829_v6, %v829_v6  ;;  %v3698_v16 = vpack.c.b16 %v1407_v8, %v1406_v5  ;;  %v999_v17 = vunpack.c.l.b16 %v655_v4  ;;  %v639_v22 = vpop.f32.mrf.mxu0 }
 0x14a   : > { %v1047_v47 = vsel %vm934_vm1, %v3647_v11, 0  ;;  %v1044_v11 = vsel %vm934_vm1, %v1025_v9, 0  ;;  %v2664_v6 = vunpack.c.l.bf16 %v3756_v52 }
 0x14b   : > { %v759_v25 = vpack.c.bf16 %v741_v19, %v741_v19  ;;  %v1403_v18 = vunpack.c.l.b16 %v855_v13  ;;  %v1005_v20 = vpack.c.b16 %v999_v17, %v998_v62  ;;  %v2665_v13 = vunpack.c.h.bf16 %v3756_v52 }
 0x14d   : > { %v1022_v33 = vunpack.c.l.b16 %v759_v25 }
 0x150   : > { %v742_v40 = vpop.f32.mrf.mxu1 }
 0x151   : > { %v743_v26 = vadd.f32 %v3526_v41, %v742_v40  ;;  %1586 = vrot.lane.b32.xlu2 %v3661_v24, %s3250_s5  ;;  %v834_v41 = vadd.f32 %v3602_v54, %v3613_v15  ;;  %v1408_v15 = vunpack.c.l.b16 %v860_v1  ;;  %v640_v40 = vadd.f32 %v3541_v61, %v639_v22  ;;  %v641_v25 = vpop.f32.mrf.mxu0 }
 0x153   : > { %v760_v32 = vpack.c.bf16 %v743_v26, %v743_v26  ;;  %v857_v44 = vpack.c.bf16 %v834_v41, %v834_v41  ;;  %v3695_v0 = vpack.c.b16 %v1409_v50, %v1408_v15  ;;  %v642_v26 = vadd.f32 %v3541_v61, %v641_v25 }
 0x154   : > { %v1512_v51 = vpop.permute.xlu2 %1511 }
 0x155   : > { %v1023_v23 = vunpack.c.l.b16 %v760_v32  ;;  %1434 = vmatpush.bf16.msrb.mxu1 %v3695_v0  ;;  %v659_v27 = vpack.c.bf16 %v642_v26, %v642_v26 }
 0x157   : > { %v1027_v43 = vpack.c.b16 %v1023_v23, %v1022_v33  ;;  %v1003_v28 = vunpack.c.l.b16 %v659_v27 }
 0x159   : > { %1592 = vrot.lane.b32.xlu1 %v1027_v43, %s3250_s5  ;;  %2522 = vmatmul.msk.bf16.gmra.mxu3 %vm934_vm1, %v3589_v58  ;;  %v1050_v46 = vsel %vm934_vm1, %v1027_v43, 0  ;;  %v827_v58 = vadd.f32 %v3602_v54, %v3569_v37  ;;  %v1405_v37 = vunpack.c.l.b16 %v857_v44  ;;  %v2643_v43 = vld [vmem:[#allocation8] sm:$0xff]   ;;  %v3764_v44 = vunpack.c.l.bf16 %v2690_v55 }
 0x15a   : > { %1056 = vmatpush.bf16.xpose.msra.mxu3 %v1050_v46  ;;  %1582 = vrot.lane.b32.xlu2 %v3670_v12, %s3250_s5  ;;  %v3741_v59 = vunpack.c.l.bf16 %v2643_v43  ;;  %v3752_v49 = vunpack.c.h.bf16 %v2643_v43 }
 0x15b   : > { %v854_v42 = vpack.c.bf16 %v827_v58, %v827_v58  ;;  %1435 = vmatpush.bf16.msrb.mxu1 %v3698_v16  ;;  %v3706_v19 = vpack.c.b16 %v1405_v37, %v1404_v14  ;;  %v3776_v37 = vunpack.c.h.bf16 %v2690_v55 }
 0x15d   : > { %v1402_v54 = vunpack.c.l.b16 %v854_v42 }
 0x15f   : > { %1436 = vmatpush.bf16.msrb.mxu1 %v3706_v19  ;;  %v3709_v21 = vpack.c.b16 %v1403_v18, %v1402_v54  ;;  %v3781_v54 = vld [vmem:[#allocation6 + $0x10] sm:$0xff]  }
 0x160   : > { %v2668_v22 = vunpack.c.l.bf16 %v3781_v54 }
 0x161   : > { %1588 = vrot.lane.b32.xlu1 %v1025_v9, %s3250_s5 }
 0x162   : > { %1057 = vmatpush.bf16.xpose.msra.mxu3 %v1047_v47  ;;  %1877 = vrot.lane.b32.xlu2 %v3645_v7, %s3250_s5  ;;  %v1041_v7 = vsel %vm934_vm1, %v3661_v24, 0 }
 0x163   : > { %1437 = vmatpush.bf16.msrb.mxu1 %v3709_v21 }
 0x169   : > { %1580 = vrot.lane.b32.xlu1 %v1005_v20, %s3250_s5  ;;  %2523 = vmatmul.msk.bf16.gmra.mxu3 %vm934_vm1, %v3622_v29  ;;  %v658_v29 = vpack.c.bf16 %v640_v40, %v640_v40 }
 0x16a   : > { %1058 = vmatpush.bf16.xpose.msra.mxu3 %v1044_v11  ;;  %1875 = vrot.lane.b32.xlu2 %v3654_v30, %s3250_s5  ;;  %v2691_v11 = vld [vmem:[#allocation8 + $0x10] sm:$0xff]  }
 0x16b   : > { %v1002_v30 = vunpack.c.l.b16 %v658_v29  ;;  %v3789_v29 = vunpack.c.l.bf16 %v2691_v11 }
 0x16d   : > { %v1007_v31 = vpack.c.b16 %v1003_v28, %v1002_v30 }
 0x16f   : > { %1584 = vrot.lane.b32.xlu0 %v1007_v31, %s3250_s5 }
 0x171   : > { %1879 = vrot.lane.b32.xlu1 %v3636_v53, %s3250_s5 }
 0x172   : > { %1059 = vmatpush.bf16.xpose.msra.mxu3 %v1041_v7 }
 0x179   : > { %2524 = vmatmul.msk.bf16.vlgmr.msra.gmra.mxu3 %vm934_vm1, %v3633_v48  ;;  %v1520_v48 = vpop.permute.xlu1 %1519 }
 0x17a   : > { %v1541_v61 = vsel %vm934_vm1, %v1520_v48, 0 }
 0x181   : > { %v1518_v33 = vpop.permute.xlu1 %1517 }
 0x182   : > { %v1538_v23 = vsel %vm934_vm1, %v1518_v33, 0  ;;  %v3804_v33 = vld [vmem:[#allocation6 + $0x18] sm:$0xff]  }
 0x189   : > { %2525 = vmatmul.msk.bf16.gmra.mxu3 %vm934_vm1, %v1005_v20 }
 0x18b   : > { %v1524_v53 = vpop.permute.xlu0 %1523 }
 0x18c   : > { %v1547_v24 = vsel %vm934_vm1, %v1524_v53, 0  ;;  %v2669_v53 = vunpack.c.h.bf16 %v3781_v54 }
 0x18d   : > { %1553 = vmatpush.bf16.xpose.msrb.mxu2 %v1547_v24 }
 0x193   : > { %v1522_v10 = vpop.permute.xlu0 %1521 }
 0x194   : > { %v1544_v32 = vsel %vm934_vm1, %v1522_v10, 0  ;;  %v3801_v10 = vunpack.c.h.bf16 %v2691_v11 }
 0x195   : > { %1554 = vmatpush.bf16.xpose.msrb.mxu2 %v1544_v32 }
 0x199   : > { %2526 = vmatmul.msk.bf16.gmra.mxu3 %vm934_vm1, %v3670_v12  ;;  %v2660_v12 = vunpack.c.l.bf16 %v3736_v38 }
 0x19b   : > { %v1514_v34 = vpop.permute.xlu0 %1513 }
 0x19d   : > { %1555 = vmatpush.bf16.xpose.msrb.mxu2 %v1541_v61 }
 0x1a3   : > { %v1516_v36 = vpop.permute.xlu0 %1515  ;;  %v1591_v60 = vpop.permute.xlu2 %1590 }
 0x1a4   : > { %v1613_v62 = vsel %vm934_vm1, %v1591_v60, 0  ;;  %v2673_v60 = vunpack.c.h.bf16 %v3804_v33 }
 0x1a5   : > { %1556 = vmatpush.bf16.xpose.msrb.mxu2 %v1538_v23 }
 0x1a9   : > { %2527 = vmatmul.msk.bf16.gmra.mxu3 %vm934_vm1, %v1007_v31 }
 0x1ab   : > { %v3738_v39 = vpop.permute.xlu0 %1578  ;;  %v1587_v5 = vpop.permute.xlu2 %1586 }
 0x1ac   : > { %2536 = vmatmul.msk.bf16.vlgmr.msrb.gmra.mxu2 %vm934_vm1, %v1510_v35  ;;  %v1607_v32 = vsel %vm934_vm1, %v1587_v5, 0 }
 0x1b3   : > { %v1882_v45 = vpop.permute.xlu0 %1881 }
 0x1b4   : > { %1903 = vmatpush.bf16.msra.mxu0 %v1882_v45  ;;  %v1583_v18 = vpop.permute.xlu2 %1582 }
 0x1bc   : > { %v968_v41 = vpop.f32.mrf.mxu3  ;;  %2537 = vmatmul.msk.bf16.gmra.mxu2 %vm934_vm1, %v1512_v51  ;;  %v1878_v28 = vpop.permute.xlu2 %1877 }
 0x1bd   : > { %v969_v1 = vadd.f32 %v2660_v12, %v968_v41 }
 0x1bf   : > { %v3747_v46 = vadd.f32 %v3741_v59, %v969_v1 }
 0x1c1   : > { %v1097_v3 = vsel %vm570_vm0, %v3747_v46, -inf }
 0x1c2   : > { %1098 = vmax.xlane.f32.xlu1 %v1097_v3 }
 0x1c4   : > { %v970_v15 = vpop.f32.mrf.mxu3  ;;  %v1876_v43 = vpop.permute.xlu2 %1875 }
 0x1c5   : > { %v971_v50 = vadd.f32 %v2661_v56, %v970_v15 }
 0x1c7   : > { %v3759_v58 = vadd.f32 %v3752_v49, %v971_v50 }
 0x1c9   : > { %v1100_v57 = vsel %vm570_vm0, %v3759_v58, -inf }
 0x1ca   : > { %1101 = vmax.xlane.f32.xlu2 %v1100_v57 }
 0x1cb   : > { %v1593_v63 = vpop.permute.xlu1 %1592 }
 0x1cc   : > { %v1616_v2 = vsel %vm934_vm1, %v1593_v63, 0  ;;  %v973_v4 = vpop.f32.mrf.mxu3  ;;  %2538 = vmatmul.msk.bf16.gmra.mxu2 %vm934_vm1, %v1514_v34  ;;  %v2692_v34 = vld [vmem:[#allocation8 + $0x18] sm:$0xff]  }
 0x1cd   : > { %v974_v8 = vadd.f32 %v2664_v6, %v973_v4  ;;  %1622 = vmatpush.bf16.xpose.msrb.mxu3 %v1616_v2  ;;  %v3812_v51 = vunpack.c.l.bf16 %v2692_v34  ;;  %v3822_v15 = vunpack.c.h.bf16 %v2692_v34 }
 0x1cf   : > { %v3771_v9 = vadd.f32 %v3764_v44, %v974_v8 }
 0x1d1   : > { %v1103_v42 = vsel %vm570_vm0, %v3771_v9, -inf }
 0x1d2   : > { %1104 = vmax.xlane.f32.xlu0 %v1103_v42 }
 0x1d3   : > { %v1589_v14 = vpop.permute.xlu1 %1588 }
 0x1d4   : > { %v975_v17 = vpop.f32.mrf.mxu3  ;;  %v1610_v25 = vsel %vm934_vm1, %v1589_v14, 0 }
 0x1d5   : > { %v976_v47 = vadd.f32 %v2665_v13, %v975_v17  ;;  %1623 = vmatpush.bf16.xpose.msrb.mxu3 %v1613_v62 }
 0x1d7   : > { %v3784_v20 = vadd.f32 %v3776_v37, %v976_v47 }
 0x1d9   : > { %v1106_v7 = vsel %vm570_vm0, %v3784_v20, -inf }
 0x1da   : > { %1107 = vmax.xlane.f32.xlu2 %v1106_v7 }
 0x1db   : > { %v1581_v40 = vpop.permute.xlu1 %1580 }
 0x1dc   : > { %2539 = vmatmul.msk.bf16.gmra.mxu2 %vm934_vm1, %v1516_v36  ;;  %v978_v26 = vpop.f32.mrf.mxu3  ;;  %v2672_v36 = vunpack.c.l.bf16 %v3804_v33 }
 0x1dd   : > { %v979_v30 = vadd.f32 %v2668_v22, %v978_v26  ;;  %1624 = vmatpush.bf16.xpose.msrb.mxu3 %v1610_v25 }
 0x1df   : > { %v3796_v27 = vadd.f32 %v3789_v29, %v979_v30 }
 0x1e1   : > { %v1109_v31 = vsel %vm570_vm0, %v3796_v27, -inf }
 0x1e2   : > { %1110 = vmax.xlane.f32.xlu1 %v1109_v31 }
 0x1e3   : > { %v1880_v24 = vpop.permute.xlu1 %1879 }
 0x1e4   : > { %1904 = vmatpush.bf16.msra.mxu0 %v1880_v24  ;;  %v980_v48 = vpop.f32.mrf.mxu3  ;;  %v3872_v24 = vld [vmem:[#allocation6 + $0x20] sm:$0xff]  }
 0x1e5   : > { %v981_v61 = vadd.f32 %v2669_v53, %v980_v48  ;;  %1625 = vmatpush.bf16.xpose.msrb.mxu3 %v1607_v32 }
 0x1e7   : > { %v3807_v23 = vadd.f32 %v3801_v10, %v981_v61 }
 0x1e8   : > { %1905 = vmatpush.bf16.msra.mxu0 %v1878_v28 }
 0x1e9   : > { %v1112_v35 = vsel %vm570_vm0, %v3807_v23, -inf }
 0x1ea   : > { %1113 = vmax.xlane.f32.xlu2 %v1112_v35 }
 0x1ec   : > { %v983_v41 = vpop.f32.mrf.mxu3  ;;  %2540 = vmatmul.msk.bf16.vlgmr.msrb.gmra.mxu3 %vm934_vm1, %v3738_v39  ;;  %1906 = vmatpush.bf16.msra.mxu0 %v1876_v43 }
 0x1ed   : > { %v984_v1 = vadd.f32 %v2672_v36, %v983_v41 }
 0x1ef   : > { %v3817_v45 = vadd.f32 %v3812_v51, %v984_v1 }
 0x1f1   : > { %v1115_v3 = vsel %vm570_vm0, %v3817_v45, -inf }
 0x1f2   : > { %1116 = vmax.xlane.f32.xlu0 %v1115_v3 }
 0x1f4   : > { %v985_v50 = vpop.f32.mrf.mxu3 }
 0x1f5   : > { %v986_v55 = vadd.f32 %v2673_v60, %v985_v50 }
 0x1f7   : > { %v3825_v57 = vadd.f32 %v3822_v15, %v986_v55 }
 0x1f9   : > { %v1118_v39 = vsel %vm570_vm0, %v3825_v57, -inf }
 0x1fa   : > { %1119 = vmax.xlane.f32.xlu1 %v1118_v39 }
 0x1fc   : > { %v1061_v63 = vpop.f32.mrf.mxu3  ;;  %2541 = vmatmul.msk.bf16.gmra.mxu3 %vm934_vm1, %v1581_v40  ;;  %v1585_v40 = vpop.permute.xlu0 %1584 }
 0x1fd   : > { %v1062_v2 = vadd.f32 %v2660_v12, %v1061_v63 }
 0x1ff   : > { %v3833_v4 = vadd.f32 %v3741_v59, %v1062_v2 }
 0x201   : > { %v1121_v5 = vsel %vm570_vm0, %v3833_v4, -inf }
 0x202   : > { %1122 = vmax.xlane.f32.xlu1 %v1121_v5  ;;  %v3896_v5 = vld [vmem:[#allocation6 + $0x28] sm:$0xff]  }
 0x204   : > { %v1063_v8 = vpop.f32.mrf.mxu3 }
 0x205   : > { %v1064_v42 = vadd.f32 %v2661_v56, %v1063_v8  ;;  %v2680_v8 = vunpack.c.l.bf16 %v3896_v5 }
 0x207   : > { %v3840_v14 = vadd.f32 %v3752_v49, %v1064_v42 }
 0x209   : > { %v1124_v62 = vsel %vm570_vm0, %v3840_v14, -inf }
 0x20a   : > { %1125 = vmax.xlane.f32.xlu2 %v1124_v62 }
 0x20c   : > { %v1066_v17 = vpop.f32.mrf.mxu3  ;;  %2542 = vmatmul.msk.bf16.gmra.mxu3 %vm934_vm1, %v1583_v18 }
 0x20d   : > { %v1067_v12 = vadd.f32 %v2664_v6, %v1066_v17 }
 0x20f   : > { %v3848_v47 = vadd.f32 %v3764_v44, %v1067_v12 }
 0x211   : > { %v1127_v38 = vsel %vm570_vm0, %v3848_v47, -inf }
 0x212   : > { %1128 = vmax.xlane.f32.xlu1 %v1127_v38 }
 0x214   : > { %v1068_v56 = vpop.f32.mrf.mxu3 }
 0x215   : > { %v1069_v11 = vadd.f32 %v2665_v13, %v1068_v56 }
 0x217   : > { %v3855_v7 = vadd.f32 %v3776_v37, %v1069_v11 }
 0x219   : > { %v1130_v18 = vsel %vm570_vm0, %v3855_v7, -inf }
 0x21a   : > { %1131 = vmax.xlane.f32.xlu2 %v1130_v18 }
 0x21c   : > { %v1071_v6 = vpop.f32.mrf.mxu3  ;;  %2543 = vmatmul.msk.bf16.gmra.mxu3 %vm934_vm1, %v1585_v40 }
 0x21d   : > { %v1072_v25 = vadd.f32 %v2668_v22, %v1071_v6  ;;  %v2676_v22 = vunpack.c.l.bf16 %v3872_v24 }
 0x21f   : > { %v3863_v26 = vadd.f32 %v3789_v29, %v1072_v25 }
 0x221   : > { %v1133_v52 = vsel %vm570_vm0, %v3863_v26, -inf }
 0x222   : > { %1134 = vmax.xlane.f32.xlu1 %v1133_v52 }
 0x224   : > { %v1073_v13 = vpop.f32.mrf.mxu3 }
 0x225   : > { %v1074_v30 = vadd.f32 %v2669_v53, %v1073_v13 }
 0x227   : > { %v3868_v28 = vadd.f32 %v3801_v10, %v1074_v30 }
 0x229   : > { %v1136_v31 = vsel %vm570_vm0, %v3868_v28, -inf }
 0x22a   : > { %1137 = vmax.xlane.f32.xlu2 %v1136_v31 }
 0x22c   : > { %v1076_v54 = vpop.f32.mrf.mxu3 }
 0x22d   : > { %v1077_v32 = vadd.f32 %v2672_v36, %v1076_v54  ;;  %v2677_v36 = vunpack.c.h.bf16 %v3872_v24  ;;  %v3922_v54 = vld [vmem:[#allocation6 + $0x30] sm:$0xff]  }
 0x22f   : > { %v1558_v48 = vpop.f32.mrf.mxu2  ;;  %v3876_v61 = vadd.f32 %v3812_v51, %v1077_v32 }
 0x230   : > { %v1559_v53 = vadd.f32 %v2676_v22, %v1558_v48 }
 0x231   : > { %v1139_v33 = vsel %vm570_vm0, %v3876_v61, -inf }
 0x232   : > { %1140 = vmax.xlane.f32.xlu1 %v1139_v33  ;;  %v3883_v34 = vadd.f32 %v3741_v59, %v1559_v53 }
 0x234   : > { %v1078_v35 = vpop.f32.mrf.mxu3  ;;  %v1663_v43 = vsel %vm570_vm0, %v3883_v34, -inf }
 0x235   : > { %v1079_v41 = vadd.f32 %v2673_v60, %v1078_v35  ;;  %1664 = vmax.xlane.f32.xlu0 %v1663_v43  ;;  %v1099_v1 = vpop.xlane.xlu1 %1098 }
 0x236   : > { %v1145_v3 = vsub.f32 %v3747_v46, %v1099_v1 }
 0x237   : > { %v1560_v50 = vpop.f32.mrf.mxu2  ;;  %v3890_v55 = vadd.f32 %v3822_v15, %v1079_v41 }
 0x238   : > { %v1161_v39 = vmul.f32 1.442695, %v1145_v3  ;;  %v1561_v63 = vadd.f32 %v2677_v36, %v1560_v50 }
 0x239   : > { %v1142_v2 = vsel %vm570_vm0, %v3890_v55, -inf }
 0x23a   : > { %2822 = vpow2.f32 %v1161_v39  ;;  %1143 = vmax.xlane.f32.xlu2 %v1142_v2  ;;  %v3899_v60 = vadd.f32 %v3752_v49, %v1561_v63 }
 0x23c   : > { %v1666_v46 = vsel %vm570_vm0, %v3899_v60, -inf }
 0x23d   : > { %v1102_v42 = vpop.xlane.xlu2 %1101  ;;  %1667 = vmax.xlane.f32.xlu1 %v1666_v46 }
 0x23e   : > { %v1146_v62 = vsub.f32 %v3759_v58, %v1102_v42  ;;  %v2681_v58 = vunpack.c.h.bf16 %v3896_v5 }
 0x23f   : > { %v1563_v17 = vpop.f32.mrf.mxu2 }
 0x240   : > { %v3905_v12 = vpop.eup %2822  ;;  %v1163_v38 = vmul.f32 1.442695, %v1146_v62  ;;  %v1564_v56 = vadd.f32 %v2680_v8, %v1563_v17 }
 0x241   : > { %v1193_v11 = vsel %vm570_vm0, %v3905_v12, 0.0 }
 0x242   : > { %1194 = vadd.xlane.f32.xlu2 %v1193_v11  ;;  %v3912_v18 = vadd.f32 %v3764_v44, %v1564_v56  ;;  %2824 = vpow2.f32 %v1163_v38  ;;  %v3950_v56 = vld [vmem:[#allocation6 + $0x38] sm:$0xff]  }
 0x244   : > { %v1669_v40 = vsel %vm570_vm0, %v3912_v18, -inf }
 0x245   : > { %1670 = vmax.xlane.f32.xlu0 %v1669_v40  ;;  %v1105_v6 = vpop.xlane.xlu0 %1104 }
 0x246   : > { %v1147_v25 = vsub.f32 %v3771_v9, %v1105_v6  ;;  %v2684_v9 = vunpack.c.l.bf16 %v3922_v54 }
 0x247   : > { %v1565_v52 = vpop.f32.mrf.mxu2 }
 0x248   : > { %v1165_v13 = vmul.f32 1.442695, %v1147_v25  ;;  %v1566_v30 = vadd.f32 %v2681_v58, %v1565_v52  ;;  %v3920_v31 = vpop.eup %2824 }
 0x249   : > { %v1196_v48 = vsel %vm570_vm0, %v3920_v31, 0.0 }
 0x24a   : > { %2826 = vpow2.f32 %v1165_v13  ;;  %v3925_v32 = vadd.f32 %v3776_v37, %v1566_v30 }
 0x24c   : > { %v1672_v53 = vsel %vm570_vm0, %v3925_v32, -inf }
 0x24d   : > { %1197 = vadd.xlane.f32.xlu0 %v1196_v48  ;;  %v1108_v33 = vpop.xlane.xlu2 %1107  ;;  %1673 = vmax.xlane.f32.xlu1 %v1672_v53 }
 0x24e   : > { %v1148_v35 = vsub.f32 %v3784_v20, %v1108_v33  ;;  %v2685_v20 = vunpack.c.h.bf16 %v3922_v54 }
 0x24f   : > { %v1568_v43 = vpop.f32.mrf.mxu2 }
 0x250   : > { %v3933_v41 = vpop.eup %2826  ;;  %v1167_v1 = vmul.f32 1.442695, %v1148_v35  ;;  %v1569_v3 = vadd.f32 %v2684_v9, %v1568_v43 }
 0x251   : > { %v1199_v50 = vsel %vm570_vm0, %v3933_v41, 0.0 }
 0x252   : > { %1200 = vadd.xlane.f32.xlu2 %v1199_v50  ;;  %v3940_v39 = vadd.f32 %v3789_v29, %v1569_v3  ;;  %2828 = vpow2.f32 %v1167_v1 }
 0x254   : > { %v1675_v63 = vsel %vm570_vm0, %v3940_v39, -inf }
 0x255   : > { %1676 = vmax.xlane.f32.xlu0 %v1675_v63  ;;  %v1111_v2 = vpop.xlane.xlu1 %1110 }
 0x256   : > { %v1149_v46 = vsub.f32 %v3796_v27, %v1111_v2  ;;  %v2688_v27 = vunpack.c.l.bf16 %v3950_v56 }
 0x257   : > { %v1570_v42 = vpop.f32.mrf.mxu2 }
 0x258   : > { %v1169_v62 = vmul.f32 1.442695, %v1149_v46  ;;  %v1571_v17 = vadd.f32 %v2685_v20, %v1570_v42  ;;  %v3948_v38 = vpop.eup %2828 }
 0x259   : > { %v1202_v40 = vsel %vm570_vm0, %v3948_v38, 0.0 }
 0x25a   : > { %2830 = vpow2.f32 %v1169_v62  ;;  %v3953_v11 = vadd.f32 %v3801_v10, %v1571_v17 }
 0x25c   : > { %v1678_v6 = vsel %vm570_vm0, %v3953_v11, -inf }
 0x25d   : > { %1203 = vadd.xlane.f32.xlu0 %v1202_v40  ;;  %v1114_v25 = vpop.xlane.xlu2 %1113  ;;  %1679 = vmax.xlane.f32.xlu1 %v1678_v6 }
 0x25e   : > { %v1150_v52 = vsub.f32 %v3807_v23, %v1114_v25  ;;  %v2689_v23 = vunpack.c.h.bf16 %v3950_v56 }
 0x25f   : > { %v1573_v13 = vpop.f32.mrf.mxu2 }
 0x260   : > { %v3961_v30 = vpop.eup %2830  ;;  %v1171_v48 = vmul.f32 1.442695, %v1150_v52  ;;  %v1574_v53 = vadd.f32 %v2688_v27, %v1573_v13 }
 0x261   : > { %v1205_v33 = vsel %vm570_vm0, %v3961_v30, 0.0 }
 0x262   : > { %1206 = vadd.xlane.f32.xlu2 %v1205_v33  ;;  %v3968_v35 = vadd.f32 %v3812_v51, %v1574_v53  ;;  %2832 = vpow2.f32 %v1171_v48 }
 0x264   : > { %v1681_v43 = vsel %vm570_vm0, %v3968_v35, -inf }
 0x265   : > { %v1117_v1 = vpop.xlane.xlu0 %1116  ;;  %1682 = vmax.xlane.f32.xlu0 %v1681_v43 }
 0x266   : > { %v1151_v3 = vsub.f32 %v3817_v45, %v1117_v1 }
 0x267   : > { %v1575_v50 = vpop.f32.mrf.mxu2 }
 0x268   : > { %v1173_v63 = vmul.f32 1.442695, %v1151_v3  ;;  %v1576_v2 = vadd.f32 %v2689_v23, %v1575_v50  ;;  %v3976_v46 = vpop.eup %2832 }
 0x269   : > { %v1208_v62 = vsel %vm570_vm0, %v3976_v46, 0.0 }
 0x26a   : > { %2834 = vpow2.f32 %v1173_v63  ;;  %v3979_v42 = vadd.f32 %v3822_v15, %v1576_v2 }
 0x26c   : > { %v1684_v17 = vsel %vm570_vm0, %v3979_v42, -inf }
 0x26d   : > { %1209 = vadd.xlane.f32.xlu0 %v1208_v62  ;;  %1685 = vmax.xlane.f32.xlu1 %v1684_v17  ;;  %v1120_v45 = vpop.xlane.xlu1 %1119 }
 0x26e   : > { %v1152_v40 = vsub.f32 %v3825_v57, %v1120_v45 }
 0x26f   : > { %v1627_v6 = vpop.f32.mrf.mxu3 }
 0x270   : > { %v3986_v25 = vpop.eup %2834  ;;  %v1175_v52 = vmul.f32 1.442695, %v1152_v40  ;;  %v1628_v13 = vadd.f32 %v2676_v22, %v1627_v6 }
 0x271   : > { %v1211_v48 = vsel %vm570_vm0, %v3986_v25, 0.0 }
 0x272   : > { %1212 = vadd.xlane.f32.xlu2 %v1211_v48  ;;  %v3993_v53 = vadd.f32 %v3741_v59, %v1628_v13  ;;  %2836 = vpow2.f32 %v1175_v52 }
 0x274   : > { %v1687_v33 = vsel %vm570_vm0, %v3993_v53, -inf }
 0x275   : > { %1688 = vmax.xlane.f32.xlu0 %v1687_v33  ;;  %v1123_v57 = vpop.xlane.xlu1 %1122 }
 0x276   : > { %v1153_v43 = vsub.f32 %v3833_v4, %v1123_v57 }
 0x277   : > { %v1629_v1 = vpop.f32.mrf.mxu3 }
 0x278   : > { %v1177_v3 = vmul.f32 1.442695, %v1153_v43  ;;  %v1630_v22 = vadd.f32 %v2677_v36, %v1629_v1  ;;  %v4000_v50 = vpop.eup %2836 }
 0x279   : > { %v1214_v2 = vsel %vm570_vm0, %v4000_v50, 0.0 }
 0x27a   : > { %2838 = vpow2.f32 %v1177_v3  ;;  %v4003_v63 = vadd.f32 %v3752_v49, %v1630_v22 }
 0x27c   : > { %v1690_v59 = vsel %vm570_vm0, %v4003_v63, -inf }
 0x27d   : > { %v1126_v62 = vpop.xlane.xlu2 %1125  ;;  %1691 = vmax.xlane.f32.xlu1 %v1690_v59  ;;  %1215 = vadd.xlane.f32.xlu0 %v1214_v2 }
 0x27e   : > { %v1154_v4 = vsub.f32 %v3840_v14, %v1126_v62 }
 0x27f   : > { %v1632_v17 = vpop.f32.mrf.mxu3 }
 0x280   : > { %v4010_v24 = vpop.eup %2838  ;;  %v1179_v36 = vmul.f32 1.442695, %v1154_v4  ;;  %v1633_v45 = vadd.f32 %v2680_v8, %v1632_v17 }
 0x281   : > { %v1217_v49 = vsel %vm570_vm0, %v4010_v24, 0.0 }
 0x282   : > { %2840 = vpow2.f32 %v1179_v36  ;;  %1218 = vadd.xlane.f32.xlu2 %v1217_v49  ;;  %v4017_v40 = vadd.f32 %v3764_v44, %v1633_v45 }
 0x284   : > { %v1693_v6 = vsel %vm570_vm0, %v4017_v40, -inf }
 0x285   : > { %1694 = vmax.xlane.f32.xlu1 %v1693_v6  ;;  %v1129_v14 = vpop.xlane.xlu1 %1128 }
 0x286   : > { %v1155_v52 = vsub.f32 %v3848_v47, %v1129_v14 }
 0x287   : > { %v1634_v13 = vpop.f32.mrf.mxu3 }
 0x288   : > { %v4022_v48 = vpop.eup %2840  ;;  %v1181_v33 = vmul.f32 1.442695, %v1155_v52  ;;  %v1635_v8 = vadd.f32 %v2681_v58, %v1634_v13 }
 0x289   : > { %v1220_v57 = vsel %vm570_vm0, %v4022_v48, 0.0 }
 0x28a   : > { %2842 = vpow2.f32 %v1181_v33  ;;  %1221 = vadd.xlane.f32.xlu0 %v1220_v57  ;;  %v4029_v43 = vadd.f32 %v3776_v37, %v1635_v8 }
 0x28c   : > { %v1696_v5 = vsel %vm570_vm0, %v4029_v43, -inf }
 0x28d   : > { %v1132_v44 = vpop.xlane.xlu2 %1131 }
 0x28e   : > { %v1156_v1 = vsub.f32 %v3855_v7, %v1132_v44 }
 0x28f   : > { %v1637_v3 = vpop.f32.mrf.mxu3 }
 0x290   : > { %v4032_v47 = vpop.eup %2842  ;;  %v1183_v22 = vmul.f32 1.442695, %v1156_v1  ;;  %v1638_v59 = vadd.f32 %v2684_v9, %v1637_v3 }
 0x291   : > { %v1223_v58 = vsel %vm570_vm0, %v4032_v47, 0.0 }
 0x292   : > { %2844 = vpow2.f32 %v1183_v22  ;;  %1697 = vmax.xlane.f32.xlu0 %v1696_v5  ;;  %1224 = vadd.xlane.f32.xlu2 %v1223_v58  ;;  %v4041_v37 = vadd.f32 %v3789_v29, %v1638_v59 }
 0x294   : > { %v1699_v7 = vsel %vm570_vm0, %v4041_v37, -inf }
 0x295   : > { %1700 = vmax.xlane.f32.xlu1 %v1699_v7  ;;  %v1135_v2 = vpop.xlane.xlu1 %1134 }
 0x296   : > { %v1157_v62 = vsub.f32 %v3863_v26, %v1135_v2 }
 0x297   : > { %v1639_v9 = vpop.f32.mrf.mxu3 }
 0x298   : > { %v4046_v4 = vpop.eup %2844  ;;  %v1185_v17 = vmul.f32 1.442695, %v1157_v62  ;;  %v1640_v36 = vadd.f32 %v2685_v20, %v1639_v9 }
 0x299   : > { %v1226_v45 = vsel %vm570_vm0, %v4046_v4, 0.0 }
 0x29a   : > { %2846 = vpow2.f32 %v1185_v17  ;;  %1227 = vadd.xlane.f32.xlu0 %v1226_v45  ;;  %v4053_v49 = vadd.f32 %v3801_v10, %v1640_v36 }
 0x29c   : > { %v1702_v13 = vsel %vm570_vm0, %v4053_v49, -inf }
 0x29d   : > { %v1138_v29 = vpop.xlane.xlu2 %1137 }
 0x29e   : > { %v1158_v6 = vsub.f32 %v3868_v28, %v1138_v29 }
 0x29f   : > { %v1642_v14 = vpop.f32.mrf.mxu3 }
 0x2a0   : > { %v4056_v26 = vpop.eup %2846  ;;  %v1187_v52 = vmul.f32 1.442695, %v1158_v6 }
 0x2a1   : > { %v1229_v54 = vsel %vm570_vm0, %v4056_v26, 0.0 }
 0x2a2   : > { %2848 = vpow2.f32 %v1187_v52  ;;  %1703 = vmax.xlane.f32.xlu0 %v1702_v13  ;;  %1230 = vadd.xlane.f32.xlu2 %v1229_v54 }
 0x2a5   : > { %v1141_v20 = vpop.xlane.xlu1 %1140 }
 0x2a6   : > { %v1159_v33 = vsub.f32 %v3876_v61, %v1141_v20 }
 0x2a7   : > { %v1644_v10 = vpop.f32.mrf.mxu3 }
 0x2a8   : > { %v4063_v8 = vpop.eup %2848  ;;  %v1189_v28 = vmul.f32 1.442695, %v1159_v33  ;;  %v1645_v57 = vadd.f32 %v2689_v23, %v1644_v10  ;;  %v1665_v44 = vpop.xlane.xlu0 %1664  ;;  %v1643_v33 = vadd.f32 %v2688_v27, %v1642_v14 }
 0x2a9   : > { %v1711_v1 = vsub.f32 %v3883_v34, %v1665_v44  ;;  %v1232_v3 = vsel %vm570_vm0, %v4063_v8, 0.0 }
 0x2aa   : > { %2850 = vpow2.f32 %v1189_v28  ;;  %1233 = vadd.xlane.f32.xlu1 %v1232_v3  ;;  %v4071_v22 = vadd.f32 %v3822_v15, %v1645_v57 }
 0x2ab   : > { %v1727_v59 = vmul.f32 1.442695, %v1711_v1 }
 0x2ac   : > { %v1708_v61 = vsel %vm570_vm0, %v4071_v22, -inf }
 0x2ad   : > { %2852 = vpow2.f32 %v1727_v59  ;;  %v1144_v5 = vpop.xlane.xlu2 %1143  ;;  %1709 = vmax.xlane.f32.xlu0 %v1708_v61 }
 0x2ae   : > { %v1160_v23 = vsub.f32 %v3890_v55, %v1144_v5 }
 0x2b0   : > { %v4076_v58 = vpop.eup %2850  ;;  %v1191_v34 = vmul.f32 1.442695, %v1160_v23  ;;  %v1668_v7 = vpop.xlane.xlu1 %1667 }
 0x2b1   : > { %v1712_v2 = vsub.f32 %v3899_v60, %v1668_v7  ;;  %v1235_v62 = vsel %vm570_vm0, %v4076_v58, 0.0 }
 0x2b2   : > { %1236 = vadd.xlane.f32.xlu2 %v1235_v62  ;;  %2854 = vpow2.f32 %v1191_v34 }
 0x2b3   : > { %v4081_v15 = vpop.eup %2852  ;;  %v1729_v9 = vmul.f32 1.442695, %v1712_v2 }
 0x2b4   : > { %v1759_v17 = vsel %vm570_vm0, %v4081_v15, 0.0 }
 0x2b5   : > { %2856 = vpow2.f32 %v1729_v9  ;;  %1760 = vadd.xlane.f32.xlu1 %v1759_v17  ;;  %v1195_v55 = vpop.xlane.xlu2 %1194 }
 0x2b6   : > { %2858 = vrcp.f32 %v1195_v55 }
 0x2b8   : > { %v1671_v36 = vpop.xlane.xlu0 %1670  ;;  %v4085_v45 = vpop.eup %2854 }
 0x2b9   : > { %v1713_v29 = vsub.f32 %v3912_v18, %v1671_v36  ;;  %v1238_v52 = vsel %vm570_vm0, %v4085_v45, 0.0 }
 0x2bb   : > { %v4088_v60 = vpop.eup %2856  ;;  %v1731_v6 = vmul.f32 1.442695, %v1713_v29 }
 0x2bc   : > { %v1762_v13 = vsel %vm570_vm0, %v4088_v60, 0.0  ;;  %v2859_v20 = vpop.eup %2858 }
 0x2bd   : > { %2860 = vpow2.f32 %v1731_v6  ;;  %1239 = vadd.xlane.f32.xlu1 %v1238_v52  ;;  %1763 = vadd.xlane.f32.xlu2 %v1762_v13  ;;  %v1257_v10 = vmul.f32 %v2859_v20, %v3905_v12 }
 0x2bf   : > { %v1273_v1 = vpack.c.bf16 %v1257_v10, %v1257_v10 }
 0x2c0   : > { %v1198_v54 = vpop.xlane.xlu0 %1197  ;;  %v1674_v44 = vpop.xlane.xlu1 %1673 }
 0x2c1   : > { %2862 = vrcp.f32 %v1198_v54  ;;  %1954 = vrot.lane.b32.xlu0 %v3695_v0, %s3250_s5  ;;  %v4105_v0 = vadd.f32 %v3812_v51, %v1643_v33  ;;  %v1297_v56 = vunpack.c.l.b16 %v1273_v1  ;;  %v1714_v9 = vsub.f32 %v3925_v32, %v1674_v44 }
 0x2c3   : > { %v4096_v18 = vpop.eup %2860  ;;  %v1705_v12 = vsel %vm570_vm0, %v4105_v0, -inf  ;;  %v1733_v13 = vmul.f32 1.442695, %v1714_v9 }
 0x2c4   : > { %v1765_v28 = vsel %vm570_vm0, %v4096_v18, 0.0 }
 0x2c5   : > { %1766 = vadd.xlane.f32.xlu1 %v1765_v28  ;;  %v1201_v59 = vpop.xlane.xlu2 %1200 }
 0x2c6   : > { %2864 = vrcp.f32 %v1201_v59 }
 0x2c7   : > { %v2863_v57 = vpop.eup %2862 }
 0x2c8   : > { %v1258_v3 = vmul.f32 %v2863_v57, %v3920_v31  ;;  %v1677_v61 = vpop.xlane.xlu0 %1676 }
 0x2ca   : > { %v1274_v5 = vpack.c.bf16 %v1258_v3, %v1258_v3 }
 0x2cc   : > { %v1298_v27 = vunpack.c.l.b16 %v1274_v5  ;;  %v2865_v7 = vpop.eup %2864 }
 0x2cd   : > { %1706 = vmax.xlane.f32.xlu1 %v1705_v12  ;;  %v1259_v51 = vmul.f32 %v2865_v7, %v3933_v41 }
 0x2ce   : > { %v1305_v14 = vpack.c.b16 %v1298_v27, %v1297_v56 }
 0x2cf   : > { %v1275_v29 = vpack.c.bf16 %v1259_v51, %v1259_v51 }
 0x2d0   : > { %v1204_v23 = vpop.xlane.xlu0 %1203  ;;  %2528 = vmatmul.msk.bf16.vlgmr.msrb.gmra.mxu0 %vm570_vm0, %v1305_v14  ;;  %v1680_v34 = vpop.xlane.xlu1 %1679 }
 0x2d1   : > { %2866 = vrcp.f32 %v1204_v23  ;;  %v1716_v31 = vsub.f32 %v3953_v11, %v1680_v34  ;;  %v1299_v54 = vunpack.c.l.b16 %v1275_v29 }
 0x2d3   : > { %v1737_v2 = vmul.f32 1.442695, %v1716_v31 }
 0x2d5   : > { %2868 = vpow2.f32 %v1737_v2  ;;  %v1207_v17 = vpop.xlane.xlu2 %1206 }
 0x2d6   : > { %2870 = vrcp.f32 %v1207_v17 }
 0x2d7   : > { %v2867_v62 = vpop.eup %2866  ;;  %2872 = vpow2.f32 %v1733_v13 }
 0x2d8   : > { %v1683_v55 = vpop.xlane.xlu0 %1682  ;;  %v1260_v36 = vmul.f32 %v2867_v62, %v3948_v38  ;;  %v1715_v38 = vsub.f32 %v3940_v39, %v1677_v61 }
 0x2d9   : > { %v1717_v5 = vsub.f32 %v3968_v35, %v1683_v55 }
 0x2da   : > { %v1276_v6 = vpack.c.bf16 %v1260_v36, %v1260_v36  ;;  %v1735_v1 = vmul.f32 1.442695, %v1715_v38 }
 0x2db   : > { %v4114_v52 = vpop.eup %2868  ;;  %v1739_v34 = vmul.f32 1.442695, %v1717_v5 }
 0x2dc   : > { %v1774_v11 = vsel %vm570_vm0, %v4114_v52, 0.0  ;;  %v1300_v20 = vunpack.c.l.b16 %v1276_v6  ;;  %v2871_v10 = vpop.eup %2870 }
 0x2dd   : > { %1775 = vadd.xlane.f32.xlu2 %v1774_v11  ;;  %v1261_v44 = vmul.f32 %v2871_v10, %v3961_v30  ;;  %v4122_v3 = vpop.eup %2872 }
 0x2de   : > { %v1306_v41 = vpack.c.b16 %v1300_v20, %v1299_v54 }
 0x2df   : > { %v1277_v14 = vpack.c.bf16 %v1261_v44, %v1261_v44 }
 0x2e0   : > { %v1210_v33 = vpop.xlane.xlu0 %1209  ;;  %2529 = vmatmul.msk.bf16.gmra.mxu0 %vm570_vm0, %v1306_v41  ;;  %v1686_v32 = vpop.xlane.xlu1 %1685 }
 0x2e1   : > { %2874 = vrcp.f32 %v1210_v33  ;;  %v1718_v28 = vsub.f32 %v3979_v42, %v1686_v32  ;;  %v1768_v42 = vsel %vm570_vm0, %v4122_v3, 0.0  ;;  %v1301_v7 = vunpack.c.l.b16 %v1277_v14 }
 0x2e3   : > { %v1741_v57 = vmul.f32 1.442695, %v1718_v28 }
 0x2e5   : > { %2876 = vpow2.f32 %v1741_v57  ;;  %v1213_v56 = vpop.xlane.xlu2 %1212 }
 0x2e6   : > { %2878 = vpow2.f32 %v1735_v1 }
 0x2e7   : > { %v2875_v59 = vpop.eup %2874  ;;  %2880 = vrcp.f32 %v1213_v56 }
 0x2e8   : > { %v1689_v27 = vpop.xlane.xlu0 %1688  ;;  %v1262_v12 = vmul.f32 %v2875_v59, %v3976_v46 }
 0x2e9   : > { %v1719_v39 = vsub.f32 %v3993_v53, %v1689_v27 }
 0x2ea   : > { %v1278_v61 = vpack.c.bf16 %v1262_v12, %v1262_v12 }
 0x2eb   : > { %v4129_v30 = vpop.eup %2876  ;;  %v1743_v23 = vmul.f32 1.442695, %v1719_v39  ;;  %1769 = vadd.xlane.f32.xlu0 %v1768_v42 }
 0x2ec   : > { %v1780_v35 = vsel %vm570_vm0, %v4129_v30, 0.0  ;;  %v1302_v31 = vunpack.c.l.b16 %v1278_v61  ;;  %v4133_v2 = vpop.eup %2878 }
 0x2ed   : > { %2882 = vpow2.f32 %v1743_v23  ;;  %1781 = vadd.xlane.f32.xlu2 %v1780_v35  ;;  %v2881_v62 = vpop.eup %2880  ;;  %v1771_v17 = vsel %vm570_vm0, %v4133_v2, 0.0 }
 0x2ee   : > { %v1307_v46 = vpack.c.b16 %v1302_v31, %v1301_v7  ;;  %2884 = vpow2.f32 %v1739_v34  ;;  %v1263_v6 = vmul.f32 %v2881_v62, %v3986_v25 }
 0x2f0   : > { %2530 = vmatmul.msk.bf16.gmra.mxu0 %vm570_vm0, %v1307_v46  ;;  %v1216_v53 = vpop.xlane.xlu0 %1215  ;;  %v1692_v51 = vpop.xlane.xlu1 %1691  ;;  %v1279_v20 = vpack.c.bf16 %v1263_v6, %v1263_v6 }
 0x2f1   : > { %2886 = vrcp.f32 %v1216_v53  ;;  %v1720_v9 = vsub.f32 %v4003_v63, %v1692_v51 }
 0x2f2   : > { %v1303_v10 = vunpack.c.l.b16 %v1279_v20 }
 0x2f3   : > { %v4139_v55 = vpop.eup %2882  ;;  %v1745_v36 = vmul.f32 1.442695, %v1720_v9  ;;  %1772 = vadd.xlane.f32.xlu0 %v1771_v17 }
 0x2f4   : > { %v1783_v29 = vsel %vm570_vm0, %v4139_v55, 0.0  ;;  %v4144_v11 = vpop.eup %2884 }
 0x2f5   : > { %2888 = vpow2.f32 %v1745_v36  ;;  %v1219_v13 = vpop.xlane.xlu2 %1218  ;;  %1784 = vadd.xlane.f32.xlu2 %v1783_v29  ;;  %v1777_v41 = vsel %vm570_vm0, %v4144_v11, 0.0 }
 0x2f6   : > { %2890 = vrcp.f32 %v1219_v13 }
 0x2f7   : > { %v2887_v54 = vpop.eup %2886 }
 0x2f8   : > { %v1264_v63 = vmul.f32 %v2887_v54, %v4000_v50  ;;  %v1695_v61 = vpop.xlane.xlu1 %1694 }
 0x2f9   : > { %v1721_v17 = vsub.f32 %v4017_v40, %v1695_v61 }
 0x2fa   : > { %v1280_v33 = vpack.c.bf16 %v1264_v63, %v1264_v63 }
 0x2fb   : > { %v4149_v32 = vpop.eup %2888  ;;  %1778 = vadd.xlane.f32.xlu0 %v1777_v41 }
 0x2fc   : > { %v1786_v25 = vsel %vm570_vm0, %v4149_v32, 0.0  ;;  %v1304_v38 = vunpack.c.l.b16 %v1280_v33  ;;  %v2891_v57 = vpop.eup %2890 }
 0x2fd   : > { %v1222_v28 = vpop.xlane.xlu0 %1221  ;;  %1787 = vadd.xlane.f32.xlu1 %v1786_v25  ;;  %v1265_v50 = vmul.f32 %v2891_v57, %v4010_v24 }
 0x2fe   : > { %2892 = vrcp.f32 %v1222_v28  ;;  %v1308_v44 = vpack.c.b16 %v1304_v38, %v1303_v10 }
 0x2ff   : > { %v1281_v59 = vpack.c.bf16 %v1265_v50, %v1265_v50 }
 0x300   : > { %2531 = vmatmul.msk.bf16.gmra.mxu0 %vm570_vm0, %v1308_v44 }
 0x301   : > { %v1382_v14 = vunpack.c.l.b16 %v1281_v59 }
 0x304   : > { %v2893_v1 = vpop.eup %2892 }
 0x305   : > { %v1266_v5 = vmul.f32 %v2893_v1, %v4022_v48  ;;  %v1698_v56 = vpop.xlane.xlu0 %1697  ;;  %v1225_v27 = vpop.xlane.xlu2 %1224 }
 0x306   : > { %2894 = vrcp.f32 %v1225_v27  ;;  %v1722_v13 = vsub.f32 %v4029_v43, %v1698_v56 }
 0x307   : > { %v1282_v12 = vpack.c.bf16 %v1266_v5, %v1266_v5 }
 0x308   : > { %v1701_v35 = vpop.xlane.xlu1 %1700  ;;  %v1749_v25 = vmul.f32 1.442695, %v1722_v13 }
 0x309   : > { %v1383_v39 = vunpack.c.l.b16 %v1282_v12 }
 0x30b   : > { %v1390_v42 = vpack.c.b16 %v1383_v39, %v1382_v14 }
 0x30c   : > { %v2895_v34 = vpop.eup %2894 }
 0x30d   : > { %v1228_v23 = vpop.xlane.xlu0 %1227  ;;  %2532 = vmatmul.msk.bf16.vlgmr.msrb.gmra.mxu1 %vm570_vm0, %v1390_v42  ;;  %1952 = vrot.lane.b32.xlu2 %v3698_v16, %s3250_s5  ;;  %v1267_v24 = vmul.f32 %v2895_v34, %v4032_v47 }
 0x30e   : > { %2896 = vrcp.f32 %v1228_v23 }
 0x30f   : > { %1948 = vrot.lane.b32.xlu0 %v3709_v21, %s3250_s5  ;;  %v1283_v46 = vpack.c.bf16 %v1267_v24, %v1267_v24 }
 0x311   : > { %v1384_v51 = vunpack.c.l.b16 %v1283_v46 }
 0x314   : > { %v2897_v48 = vpop.eup %2896 }
 0x315   : > { %v1231_v7 = vpop.xlane.xlu2 %1230  ;;  %v1268_v31 = vmul.f32 %v2897_v48, %v4046_v4  ;;  %v1704_v36 = vpop.xlane.xlu0 %1703 }
 0x316   : > { %1950 = vrot.lane.b32.xlu1 %v3706_v19, %s3250_s5  ;;  %2898 = vrcp.f32 %v1231_v7  ;;  %v1747_v19 = vmul.f32 1.442695, %v1721_v17  ;;  %v1724_v40 = vsub.f32 %v4053_v49, %v1704_v36  ;;  %s2280_s5 = scalar_lea.sflag [#allocation5], %s3459_s28 }
 0x317   : > { %v1284_v53 = vpack.c.bf16 %v1268_v31, %v1268_v31 }
 0x318   : > { %v1753_v43 = vmul.f32 1.442695, %v1724_v40 }
 0x319   : > { %v1385_v16 = vunpack.c.l.b16 %v1284_v53 }
 0x31b   : > { %v1391_v62 = vpack.c.b16 %v1385_v16, %v1384_v51 }
 0x31c   : > { %v2899_v21 = vpop.eup %2898 }
 0x31d   : > { %2533 = vmatmul.msk.bf16.gmra.mxu1 %vm570_vm0, %v1391_v62  ;;  %v1234_v9 = vpop.xlane.xlu1 %1233  ;;  %v1269_v47 = vmul.f32 %v2899_v21, %v4056_v26 }
 0x31e   : > { %2900 = vrcp.f32 %v1234_v9 }
 0x31f   : > { %v1285_v6 = vpack.c.bf16 %v1269_v47, %v1269_v47  ;;  %2902 = vpow2.f32 %v1747_v19 }
 0x320   : > { %v1710_v10 = vpop.xlane.xlu0 %1709 }
 0x321   : > { %v1386_v41 = vunpack.c.l.b16 %v1285_v6  ;;  %v1726_v27 = vsub.f32 %v4071_v22, %v1710_v10 }
 0x324   : > { %v2901_v4 = vpop.eup %2900 }
 0x325   : > { %v1270_v29 = vmul.f32 %v2901_v4, %v4063_v8  ;;  %v1237_v63 = vpop.xlane.xlu2 %1236  ;;  %v1723_v8 = vsub.f32 %v4041_v37, %v1701_v35  ;;  %v4173_v38 = vpop.eup %2902 }
 0x326   : > { %v1789_v37 = vsel %vm570_vm0, %v4173_v38, 0.0 }
 0x327   : > { %v1286_v54 = vpack.c.bf16 %v1270_v29, %v1270_v29  ;;  %v1751_v1 = vmul.f32 1.442695, %v1723_v8 }
 0x328   : > { %v1761_v20 = vpop.xlane.xlu1 %1760 }
 0x329   : > { %v1387_v33 = vunpack.c.l.b16 %v1286_v54  ;;  %2904 = vrcp.f32 %v1761_v20 }
 0x32a   : > { %2906 = vrcp.f32 %v1237_v63 }
 0x32b   : > { %v1392_v26 = vpack.c.b16 %v1387_v33, %v1386_v41  ;;  %2908 = vpow2.f32 %v1749_v25 }
 0x32d   : > { %2534 = vmatmul.msk.bf16.gmra.mxu1 %vm570_vm0, %v1392_v26 }
 0x32f   : > { %v2905_v44 = vpop.eup %2904 }
 0x330   : > { %v1764_v28 = vpop.xlane.xlu2 %1763  ;;  %v1240_v57 = vpop.xlane.xlu1 %1239  ;;  %v1823_v49 = vmul.f32 %v2905_v44, %v4081_v15 }
 0x331   : > { %2910 = vrcp.f32 %v1764_v28  ;;  %v2907_v50 = vpop.eup %2906 }
 0x332   : > { %2912 = vrcp.f32 %v1240_v57  ;;  %v4176_v5 = vpop.eup %2908  ;;  %v1271_v56 = vmul.f32 %v2907_v50, %v4076_v58  ;;  %v1839_v39 = vpack.c.bf16 %v1823_v49, %v1823_v49  ;;  %v1757_v58 = vmul.f32 1.442695, %v1726_v27 }
 0x333   : > { %v1955_v59 = vpop.permute.xlu0 %1954  ;;  %2914 = vpow2.f32 %v1753_v43  ;;  %v1792_v15 = vsel %vm570_vm0, %v4176_v5, 0.0 }
 0x334   : > { %1976 = vmatpush.bf16.msra.mxu1 %v1955_v59  ;;  %2916 = vpow2.f32 %v1751_v1  ;;  %v1287_v34 = vpack.c.bf16 %v1271_v56, %v1271_v56  ;;  %v1863_v7 = vunpack.c.l.b16 %v1839_v39 }
 0x335   : > { %2918 = vpow2.f32 %v1757_v58 }
 0x336   : > { %1790 = vadd.xlane.f32.xlu2 %v1789_v37  ;;  %v1388_v46 = vunpack.c.l.b16 %v1287_v34 }
 0x337   : > { %v2911_v12 = vpop.eup %2910 }
 0x338   : > { %v2913_v14 = vpop.eup %2912  ;;  %v1824_v42 = vmul.f32 %v2911_v12, %v4088_v60  ;;  %v1767_v61 = vpop.xlane.xlu1 %1766 }
 0x339   : > { %1793 = vadd.xlane.f32.xlu0 %v1792_v15  ;;  %v1272_v23 = vmul.f32 %v2913_v14, %v4085_v45  ;;  %v4186_v24 = vpop.eup %2914 }
 0x33a   : > { %v1840_v48 = vpack.c.bf16 %v1824_v42, %v1824_v42  ;;  %v4188_v22 = vpop.eup %2916  ;;  %v1798_v60 = vsel %vm570_vm0, %v4186_v24, 0.0 }
 0x33b   : > { %v1288_v35 = vpack.c.bf16 %v1272_v23, %v1272_v23  ;;  %v1795_v45 = vsel %vm570_vm0, %v4188_v22, 0.0  ;;  %v4197_v47 = vpop.eup %2918 }
 0x33c   : > { %v1864_v31 = vunpack.c.l.b16 %v1840_v48  ;;  %v1804_v17 = vsel %vm570_vm0, %v4197_v47, 0.0 }
 0x33d   : > { %v1389_v53 = vunpack.c.l.b16 %v1288_v35 }
 0x33e   : > { %v1871_v51 = vpack.c.b16 %v1864_v31, %v1863_v7  ;;  %1799 = vadd.xlane.f32.xlu2 %v1798_v60 }
 0x33f   : > { %v1393_v16 = vpack.c.b16 %v1389_v53, %v1388_v46 }
 0x340   : > { %1796 = vadd.xlane.f32.xlu1 %v1795_v45  ;;  %2544 = vmatmul.msk.bf16.vlgmr.msra.gmra.mxu0 %vm570_vm0, %v1871_v51  ;;  %v1707_v62 = vpop.xlane.xlu1 %1706 }
 0x341   : > { %2535 = vmatmul.msk.bf16.gmra.mxu1 %vm570_vm0, %v1393_v16  ;;  %v1725_v9 = vsub.f32 %v4105_v0, %v1707_v62 }
 0x343   : > { %v1755_v21 = vmul.f32 1.442695, %v1725_v9 }
 0x345   : > { %2920 = vpow2.f32 %v1755_v21 }
 0x346   : > { %2922 = vrcp.f32 %v1767_v61 }
 0x348   : > { %1805 = vadd.xlane.f32.xlu1 %v1804_v17 }
 0x34b   : > { %v4201_v36 = vpop.eup %2920 }
 0x34c   : > { %v1801_v4 = vsel %vm570_vm0, %v4201_v36, 0.0  ;;  %v2923_v41 = vpop.eup %2922 }
 0x34d   : > { %v1354_v29 = vpop.f32.mrf.mxu0  ;;  %1802 = vadd.xlane.f32.xlu0 %v1801_v4  ;;  %v1825_v25 = vmul.f32 %v2923_v41, %v4096_v18 }
 0x34e   : > { %v1459_v6 = vpack.c.bf16 %v1354_v29, %v1354_v29 }
 0x34f   : > { %v1841_v40 = vpack.c.bf16 %v1825_v25, %v1825_v25 }
 0x350   : > { %1476 = vst.msk [vmem:[#allocation2] sm:$0xf] %vm1475_vm2, %v1459_v6  ;;  %v1776_v13 = vpop.xlane.xlu2 %1775 }
 0x351   : > { %v1865_v50 = vunpack.c.l.b16 %v1841_v40 }
 0x355   : > { %v1356_v0 = vpop.f32.mrf.mxu0 }
 0x356   : > { %v1460_v19 = vpack.c.bf16 %v1356_v0, %v1356_v0 }
 0x358   : > { %1477 = vst.msk [vmem:[#allocation2 + $0x4] sm:$0xf] %vm1475_vm2, %v1460_v19 }
 0x35d   : > { %v1359_v54 = vpop.f32.mrf.mxu0 }
 0x35e   : > { %v1461_v63 = vpack.c.bf16 %v1359_v54, %v1359_v54  ;;  %v1770_v20 = vpop.xlane.xlu0 %1769 }
 0x35f   : > { %2924 = vrcp.f32 %v1770_v20 }
 0x360   : > { %1478 = vst.msk [vmem:[#allocation2 + $0x8] sm:$0xf] %vm1475_vm2, %v1461_v63  ;;  %v1782_v33 = vpop.xlane.xlu2 %1781 }
 0x365   : > { %v2925_v10 = vpop.eup %2924  ;;  %v1361_v26 = vpop.f32.mrf.mxu0 }
 0x366   : > { %v1826_v8 = vmul.f32 %v2925_v10, %v4122_v3  ;;  %v1462_v43 = vpack.c.bf16 %v1361_v26, %v1361_v26  ;;  %v1773_v28 = vpop.xlane.xlu0 %1772 }
 0x367   : > { %2926 = vrcp.f32 %v1773_v28 }
 0x368   : > { %v1842_v57 = vpack.c.bf16 %v1826_v8, %v1826_v8  ;;  %1479 = vst.msk [vmem:[#allocation2 + $0xc] sm:$0xf] %vm1475_vm2, %v1462_v43  ;;  %v1785_v44 = vpop.xlane.xlu2 %1784  ;;  %2928 = vrcp.f32 %v1776_v13 }
 0x36a   : > { %v1866_v1 = vunpack.c.l.b16 %v1842_v57 }
 0x36c   : > { %v1872_v59 = vpack.c.b16 %v1866_v1, %v1865_v50 }
 0x36d   : > { %v2927_v49 = vpop.eup %2926  ;;  %v1364_v37 = vpop.f32.mrf.mxu0 }
 0x36e   : > { %v1463_v56 = vpack.c.bf16 %v1364_v37, %v1364_v37  ;;  %2545 = vmatmul.msk.bf16.gmra.mxu0 %vm570_vm0, %v1872_v59  ;;  %v2929_v18 = vpop.eup %2928  ;;  %v1827_v27 = vmul.f32 %v2927_v49, %v4133_v2  ;;  %v1779_v39 = vpop.xlane.xlu0 %1778 }
 0x36f   : > { %v1828_v12 = vmul.f32 %v2929_v18, %v4114_v52  ;;  %2930 = vrcp.f32 %v1779_v39 }
 0x370   : > { %1480 = vst.msk [vmem:[#allocation2 + $0x10] sm:$0xf] %vm1475_vm2, %v1463_v56  ;;  %v1953_v3 = vpop.permute.xlu2 %1952  ;;  %v1843_v14 = vpack.c.bf16 %v1827_v27, %v1827_v27  ;;  %v1788_v15 = vpop.xlane.xlu1 %1787  ;;  %2932 = vrcp.f32 %v1782_v33 }
 0x371   : > { %1977 = vmatpush.bf16.msra.mxu1 %v1953_v3  ;;  %v1844_v61 = vpack.c.bf16 %v1828_v12, %v1828_v12  ;;  %2934 = vrcp.f32 %v1788_v15 }
 0x372   : > { %v1867_v34 = vunpack.c.l.b16 %v1843_v14  ;;  %2936 = vrcp.f32 %v1785_v44 }
 0x373   : > { %v1868_v58 = vunpack.c.l.b16 %v1844_v61 }
 0x375   : > { %v1366_v42 = vpop.f32.mrf.mxu0  ;;  %v1873_v2 = vpack.c.b16 %v1868_v58, %v1867_v34  ;;  %v2931_v48 = vpop.eup %2930 }
 0x376   : > { %v1464_v23 = vpack.c.bf16 %v1366_v42, %v1366_v42  ;;  %v2933_v7 = vpop.eup %2932  ;;  %v1829_v60 = vmul.f32 %v2931_v48, %v4144_v11 }
 0x377   : > { %v2935_v52 = vpop.eup %2934  ;;  %v1830_v53 = vmul.f32 %v2933_v7, %v4129_v30 }
 0x378   : > { %1481 = vst.msk [vmem:[#allocation2 + $0x14] sm:$0xf] %vm1475_vm2, %v1464_v23  ;;  %v2937_v46 = vpop.eup %2936  ;;  %v1832_v51 = vmul.f32 %v2935_v52, %v4149_v32  ;;  %v1845_v16 = vpack.c.bf16 %v1829_v60, %v1829_v60 }
 0x379   : > { %v1831_v45 = vmul.f32 %v2937_v46, %v4139_v55  ;;  %v1846_v9 = vpack.c.bf16 %v1830_v53, %v1830_v53 }
 0x37a   : > { %v1848_v21 = vpack.c.bf16 %v1832_v51, %v1832_v51  ;;  %v1869_v29 = vunpack.c.l.b16 %v1845_v16 }
 0x37b   : > { %v1847_v4 = vpack.c.bf16 %v1831_v45, %v1831_v45  ;;  %v1870_v11 = vunpack.c.l.b16 %v1846_v9 }
 0x37c   : > { %v1937_v0 = vunpack.c.l.b16 %v1848_v21 }
 0x37d   : > { %v1369_v35 = vpop.f32.mrf.mxu0  ;;  %v1936_v30 = vunpack.c.l.b16 %v1847_v4  ;;  %v1874_v32 = vpack.c.b16 %v1870_v11, %v1869_v29 }
 0x37e   : > { %v1465_v31 = vpack.c.bf16 %v1369_v35, %v1369_v35  ;;  %2546 = vmatmul.msk.bf16.gmra.mxu0 %vm570_vm0, %v1873_v2 }
 0x37f   : > { %v1944_v55 = vpack.c.b16 %v1937_v0, %v1936_v30 }
 0x380   : > { %1482 = vst.msk [vmem:[#allocation2 + $0x18] sm:$0xf] %vm1475_vm2, %v1465_v31 }
 0x381   : > { %v1949_v54 = vpop.permute.xlu0 %1948 }
 0x385   : > { %v1371_v62 = vpop.f32.mrf.mxu0 }
 0x386   : > { %v1466_v17 = vpack.c.bf16 %v1371_v62, %v1371_v62 }
 0x388   : > { %1483 = vst.msk [vmem:[#allocation2 + $0x1c] sm:$0xf] %vm1475_vm2, %v1466_v17  ;;  %v1951_v6 = vpop.permute.xlu1 %1950 }
 0x389   : > { %1978 = vmatpush.bf16.msra.mxu1 %v1951_v6 }
 0x38a   : > { %v1439_v19 = vpop.f32.mrf.mxu1 }
 0x38b   : > { %v1467_v13 = vpack.c.bf16 %v1439_v19, %v1439_v19  ;;  %v2639_v19 = vld [vmem:[#allocation14 + $0x18] sm:$0xff] }
 0x38c   : > { %2218 = vmatpush.bf16.msra.mxu2 %v2639_v19 }
 0x38d   : > { %1484 = vst.msk [vmem:[#allocation2 + $0x20] sm:$0xf] %vm1475_vm2, %v1467_v13  ;;  %1979 = vmatpush.bf16.msra.mxu1 %v1949_v54 }
 0x38e   : > { %2547 = vmatmul.msk.bf16.gmra.mxu0 %vm570_vm0, %v1874_v32 }
 0x390   : > { %2548 = vmatmul.msk.bf16.vlgmr.msra.gmra.mxu1 %vm570_vm0, %v1944_v55 }
 0x392   : > { %v1441_v63 = vpop.f32.mrf.mxu1 }
 0x393   : > { %v1468_v20 = vpack.c.bf16 %v1441_v63, %v1441_v63 }
 0x395   : > { %1485 = vst.msk [vmem:[#allocation2 + $0x24] sm:$0xf] %vm1475_vm2, %v1468_v20 }
 0x39a   : > { %v1444_v41 = vpop.f32.mrf.mxu1 }
 0x39b   : > { %v1469_v33 = vpack.c.bf16 %v1444_v41, %v1444_v41 }
 0x39d   : > { %1486 = vst.msk [vmem:[#allocation2 + $0x28] sm:$0xf] %vm1475_vm2, %v1469_v33 }
 0x3a2   : > { %v1446_v25 = vpop.f32.mrf.mxu1 }
 0x3a3   : > { %v1470_v10 = vpack.c.bf16 %v1446_v25, %v1446_v25  ;;  %v2638_v25 = vld [vmem:[#allocation14 + $0x10] sm:$0xff] }
 0x3a4   : > { %2219 = vmatpush.bf16.msra.mxu2 %v2638_v25 }
 0x3a5   : > { %1487 = vst.msk [vmem:[#allocation2 + $0x2c] sm:$0xf] %vm1475_vm2, %v1470_v10 }
 0x3a9   : > { %v1791_v26 = vpop.xlane.xlu2 %1790 }
 0x3aa   : > { %2938 = vrcp.f32 %v1791_v26  ;;  %v1449_v40 = vpop.f32.mrf.mxu1  ;;  %v2637_v26 = vld [vmem:[#allocation14 + $0x8] sm:$0xff] }
 0x3ab   : > { %v1471_v8 = vpack.c.bf16 %v1449_v40, %v1449_v40  ;;  %2220 = vmatpush.bf16.msra.mxu2 %v2637_v26  ;;  %v2636_v40 = vld [vmem:[#allocation14] sm:$0xff] }
 0x3ac   : > { %v1794_v43 = vpop.xlane.xlu0 %1793 }
 0x3ad   : > { %1488 = vst.msk [vmem:[#allocation2 + $0x30] sm:$0xf] %vm1475_vm2, %v1471_v8  ;;  %2940 = vrcp.f32 %v1794_v43 }
 0x3af   : > { %2221 = vmatpush.bf16.msra.mxu2 %v2636_v40 }
 0x3b0   : > { %v2939_v28 = vpop.eup %2938 }
 0x3b1   : > { %v1833_v57 = vmul.f32 %v2939_v28, %v4173_v38  ;;  %v1800_v56 = vpop.xlane.xlu2 %1799 }
 0x3b2   : > { %v1451_v44 = vpop.f32.mrf.mxu1 }
 0x3b3   : > { %v2941_v50 = vpop.eup %2940  ;;  %v1472_v1 = vpack.c.bf16 %v1451_v44, %v1451_v44  ;;  %v1797_v59 = vpop.xlane.xlu1 %1796  ;;  %v1849_v49 = vpack.c.bf16 %v1833_v57, %v1833_v57 }
 0x3b4   : > { %v1834_v37 = vmul.f32 %v2941_v50, %v4176_v5  ;;  %2942 = vrcp.f32 %v1797_v59 }
 0x3b5   : > { %1489 = vst.msk [vmem:[#allocation2 + $0x34] sm:$0xf] %vm1475_vm2, %v1472_v1  ;;  %2944 = vrcp.f32 %v1800_v56  ;;  %v1938_v27 = vunpack.c.l.b16 %v1849_v49 }
 0x3b6   : > { %v1850_v18 = vpack.c.bf16 %v1834_v37, %v1834_v37 }
 0x3b8   : > { %v1939_v3 = vunpack.c.l.b16 %v1850_v18 }
 0x3ba   : > { %v1945_v12 = vpack.c.b16 %v1939_v3, %v1938_v27  ;;  %v2943_v14 = vpop.eup %2942 }
 0x3bb   : > { %v2945_v38 = vpop.eup %2944  ;;  %v1835_v42 = vmul.f32 %v2943_v14, %v4188_v22  ;;  %v1806_v48 = vpop.xlane.xlu1 %1805 }
 0x3bc   : > { %2549 = vmatmul.msk.bf16.gmra.mxu1 %vm570_vm0, %v1945_v12  ;;  %v1836_v5 = vmul.f32 %v2945_v38, %v4186_v24 }
 0x3bd   : > { %v1908_v39 = vpop.f32.mrf.mxu0  ;;  %v1851_v34 = vpack.c.bf16 %v1835_v42, %v1835_v42 }
 0x3be   : > { %v1454_v61 = vpop.f32.mrf.mxu1  ;;  %v2001_v15 = vpack.c.bf16 %v1908_v39, %v1908_v39  ;;  %v1852_v2 = vpack.c.bf16 %v1836_v5, %v1836_v5 }
 0x3bf   : > { %v1473_v23 = vpack.c.bf16 %v1454_v61, %v1454_v61  ;;  %v1940_v7 = vunpack.c.l.b16 %v1851_v34 }
 0x3c0   : > { %2033 = vrot.lane.b32.xlu2 %v2001_v15, %s3251_s13  ;;  %v1803_v58 = vpop.xlane.xlu0 %1802  ;;  %v1941_v60 = vunpack.c.l.b16 %v1852_v2 }
 0x3c1   : > { %1490 = vst.msk [vmem:[#allocation2 + $0x38] sm:$0xf] %vm1475_vm2, %v1473_v23  ;;  %2946 = vrcp.f32 %v1803_v58 }
 0x3c2   : > { %2948 = vrcp.f32 %v1806_v48  ;;  %v1946_v24 = vpack.c.b16 %v1941_v60, %v1940_v7 }
 0x3c5   : > { %v1910_v35 = vpop.f32.mrf.mxu0 }
 0x3c6   : > { %v1456_v31 = vpop.f32.mrf.mxu1  ;;  %v2002_v52 = vpack.c.bf16 %v1910_v35, %v1910_v35 }
 0x3c7   : > { %v1474_v22 = vpack.c.bf16 %v1456_v31, %v1456_v31  ;;  %v2947_v46 = vpop.eup %2946 }
 0x3c8   : > { %2035 = vrot.lane.b32.xlu0 %v2002_v52, %s3251_s13  ;;  %v2949_v53 = vpop.eup %2948  ;;  %v1837_v51 = vmul.f32 %v2947_v46, %v4201_v36 }
 0x3c9   : > { %1491 = vst.msk [vmem:[#allocation2 + $0x3c] sm:$0xf] %vm1475_vm2, %v1474_v22  ;;  %v1838_v45 = vmul.f32 %v2949_v53, %v4197_v47  ;;  %v2821_v22 = vld [vmem:[%s4364_s10] ss:$0 sm:$0xff] }
 0x3ca   : > { %v1853_v16 = vpack.c.bf16 %v1837_v51, %v1837_v51 }
 0x3cb   : > { %v1854_v62 = vpack.c.bf16 %v1838_v45, %v1838_v45 }
 0x3cc   : > { %2550 = vmatmul.msk.bf16.gmra.mxu1 %vm570_vm0, %v1946_v24  ;;  %v1942_v9 = vunpack.c.l.b16 %v1853_v16 }
 0x3cd   : > { %v1943_v21 = vunpack.c.l.b16 %v1854_v62 }
 0x3cf   : > { %v1947_v17 = vpack.c.b16 %v1943_v21, %v1942_v9 }
 0x3dc   : > { %2551 = vmatmul.msk.bf16.gmra.mxu1 %vm570_vm0, %v1947_v17 }
 0x3eb   : > { %v1913_v4 = vpop.f32.mrf.mxu0 }
 0x3ec   : > { %v2003_v29 = vpack.c.bf16 %v1913_v4, %v1913_v4 }
 0x3ee   : > { %2037 = vrot.lane.b32.xlu1 %v2003_v29, %s3251_s13 }
 0x3f3   : > { %v1915_v6 = vpop.f32.mrf.mxu0 }
 0x3f4   : > { %v2004_v11 = vpack.c.bf16 %v1915_v6, %v1915_v6 }
 0x3f6   : > { %2039 = vrot.lane.b32.xlu0 %v2004_v11, %s3251_s13 }
 0x3fb   : > { %v1918_v0 = vpop.f32.mrf.mxu0 }
 0x3fc   : > { %v2005_v36 = vpack.c.bf16 %v1918_v0, %v1918_v0 }
 0x3fe   : > { %2041 = vrot.lane.b32.xlu2 %v2005_v36, %s3251_s13 }
 0x403   : > { %v1920_v47 = vpop.f32.mrf.mxu0 }
 0x404   : > { %v2006_v13 = vpack.c.bf16 %v1920_v47, %v1920_v47 }
 0x406   : > { %2043 = vrot.lane.b32.xlu1 %v2006_v13, %s3251_s13 }
 0x40b   : > { %v1923_v30 = vpop.f32.mrf.mxu0 }
 0x40c   : > { %v2007_v54 = vpack.c.bf16 %v1923_v30, %v1923_v30 }
 0x40d   : > { %v1981_v32 = vpop.f32.mrf.mxu1 }
 0x40e   : > { %v2009_v55 = vpack.c.bf16 %v1981_v32, %v1981_v32  ;;  %2045 = vrot.lane.b32.xlu0 %v2007_v54, %s3251_s13 }
 0x410   : > { %2049 = vrot.lane.b32.xlu1 %v2009_v55, %s3251_s13 }
 0x413   : > { %v1925_v63 = vpop.f32.mrf.mxu0 }
 0x414   : > { %v2008_v20 = vpack.c.bf16 %v1925_v63, %v1925_v63 }
 0x415   : > { %v1983_v41 = vpop.f32.mrf.mxu1 }
 0x416   : > { %v2010_v33 = vpack.c.bf16 %v1983_v41, %v1983_v41  ;;  %2047 = vrot.lane.b32.xlu2 %v2008_v20, %s3251_s13 }
 0x418   : > { %2051 = vrot.lane.b32.xlu0 %v2010_v33, %s3251_s13 }
 0x41a   : > { %v2034_v10 = vpop.permute.xlu2 %2033 }
 0x41b   : > { %2082 = vst.msk [vmem:[#allocation2] sm:$0xf] %vm2081_vm3, %v2034_v10 }
 0x439   : > { %v1986_v8 = vpop.f32.mrf.mxu1 }
 0x43a   : > { %v2011_v43 = vpack.c.bf16 %v1986_v8, %v1986_v8  ;;  %v2036_v28 = vpop.permute.xlu0 %2035 }
 0x43b   : > { %2083 = vst.msk [vmem:[#allocation2 + $0x4] sm:$0xf] %vm2081_vm3, %v2036_v28 }
 0x43c   : > { %2053 = vrot.lane.b32.xlu2 %v2011_v43, %s3251_s13 }
 0x441   : > { %v1988_v57 = vpop.f32.mrf.mxu1 }
 0x442   : > { %v2012_v44 = vpack.c.bf16 %v1988_v57, %v1988_v57  ;;  %v2628_v50 = vld [vmem:[#allocation2] sm:$0xff] }
 0x443   : > { %2600 = vmatmul.msk.bf16.vlgmr.msra.gmra.mxu2 %vm570_vm0, %v2628_v50 }
 0x444   : > { %2055 = vrot.lane.b32.xlu1 %v2012_v44, %s3251_s13 }
 0x449   : > { %v1991_v1 = vpop.f32.mrf.mxu1 }
 0x44a   : > { %v2013_v59 = vpack.c.bf16 %v1991_v1, %v1991_v1 }
 0x44c   : > { %2057 = vrot.lane.b32.xlu0 %v2013_v59, %s3251_s13 }
 0x451   : > { %v1993_v49 = vpop.f32.mrf.mxu1 }
 0x452   : > { %v2014_v37 = vpack.c.bf16 %v1993_v49, %v1993_v49 }
 0x454   : > { %2059 = vrot.lane.b32.xlu2 %v2014_v37, %s3251_s13 }
 0x458   : > { %v2042_v56 = vpop.permute.xlu2 %2041 }
 0x459   : > { %2086 = vst.msk [vmem:[#allocation2 + $0x10] sm:$0xf] %vm2081_vm3, %v2042_v56  ;;  %v1996_v18 = vpop.f32.mrf.mxu1 }
 0x45a   : > { %v2015_v27 = vpack.c.bf16 %v1996_v18, %v1996_v18 }
 0x45c   : > { %2061 = vrot.lane.b32.xlu1 %v2015_v27, %s3251_s13 }
 0x460   : > { %v2038_v3 = vpop.permute.xlu1 %2037 }
 0x461   : > { %2084 = vst.msk [vmem:[#allocation2 + $0x8] sm:$0xf] %vm2081_vm3, %v2038_v3  ;;  %v1998_v12 = vpop.f32.mrf.mxu1 }
 0x462   : > { %v2016_v14 = vpack.c.bf16 %v1998_v12, %v1998_v12 }
 0x464   : > { %2063 = vrot.lane.b32.xlu0 %v2016_v14, %s3251_s13 }
 0x468   : > { %v2040_v38 = vpop.permute.xlu0 %2039 }
 0x469   : > { %2085 = vst.msk [vmem:[#allocation2 + $0xc] sm:$0xf] %vm2081_vm3, %v2040_v38 }
 0x470   : > { %v2048_v39 = vpop.permute.xlu2 %2047  ;;  %v2629_v42 = vld [vmem:[#allocation2 + $0x8] sm:$0xff] }
 0x471   : > { %2089 = vst.msk [vmem:[#allocation2 + $0x1c] sm:$0xf] %vm2081_vm3, %v2048_v39  ;;  %2601 = vmatmul.msk.bf16.gmra.mxu2 %vm570_vm0, %v2629_v42 }
 0x478   : > { %v2044_v61 = vpop.permute.xlu1 %2043 }
 0x479   : > { %2087 = vst.msk [vmem:[#allocation2 + $0x14] sm:$0xf] %vm2081_vm3, %v2044_v61 }
 0x480   : > { %v2046_v15 = vpop.permute.xlu0 %2045  ;;  %v2630_v23 = vld [vmem:[#allocation2 + $0x10] sm:$0xff] }
 0x481   : > { %2088 = vst.msk [vmem:[#allocation2 + $0x18] sm:$0xf] %vm2081_vm3, %v2046_v15  ;;  %2602 = vmatmul.msk.bf16.gmra.mxu2 %vm570_vm0, %v2630_v23 }
 0x482   : > { %v2050_v5 = vpop.permute.xlu1 %2049 }
 0x483   : > { %2090 = vst.msk [vmem:[#allocation2 + $0x20] sm:$0xf] %vm2081_vm3, %v2050_v5 }
 0x488   : > { %v2631_v58 = vld [vmem:[#allocation2 + $0x18] sm:$0xff] }
 0x48a   : > { %v2052_v34 = vpop.permute.xlu0 %2051 }
 0x48b   : > { %2091 = vst.msk [vmem:[#allocation2 + $0x24] sm:$0xf] %vm2081_vm3, %v2052_v34 }
 0x491   : > { %2603 = vmatmul.msk.bf16.gmra.mxu2 %vm570_vm0, %v2631_v58 }
 0x492   : > { %v2632_v48 = vld [vmem:[#allocation2 + $0x20] sm:$0xff] }
 0x496   : > { %v2054_v2 = vpop.permute.xlu2 %2053 }
 0x497   : > { %2092 = vst.msk [vmem:[#allocation2 + $0x28] sm:$0xf] %vm2081_vm3, %v2054_v2 }
 0x4a1   : > { %2604 = vmatmul.msk.bf16.gmra.mxu2 %vm570_vm0, %v2632_v48 }
 0x4ae   : > { %v2060_v35 = vpop.permute.xlu2 %2059 }
 0x4af   : > { %2095 = vst.msk [vmem:[#allocation2 + $0x34] sm:$0xf] %vm2081_vm3, %v2060_v35 }
 0x4b6   : > { %v2056_v7 = vpop.permute.xlu1 %2055 }
 0x4b7   : > { %2093 = vst.msk [vmem:[#allocation2 + $0x2c] sm:$0xf] %vm2081_vm3, %v2056_v7 }
 0x4be   : > { %v2058_v31 = vpop.permute.xlu0 %2057  ;;  %v2633_v52 = vld [vmem:[#allocation2 + $0x28] sm:$0xff] }
 0x4bf   : > { %2094 = vst.msk [vmem:[#allocation2 + $0x30] sm:$0xf] %vm2081_vm3, %v2058_v31  ;;  %2605 = vmatmul.msk.bf16.gmra.mxu2 %vm570_vm0, %v2633_v52 }
 0x4c6   : > { %v2223_v60 = vpop.f32.mrf.mxu2  ;;  %v2634_v53 = vld [vmem:[#allocation2 + $0x30] sm:$0xff] }
 0x4c7   : > { %v2224_v24 = vadd.f32 %v2821_v22, %v2223_v60 }
 0x4c9   : > { %2263 = vst.msk [vmem:[%s4283_s26] sm:$0xff] %vm570_vm0, %v2224_v24 }
 0x4ce   : > { %v2062_v46 = vpop.permute.xlu1 %2061  ;;  %v2225_v51 = vpop.f32.mrf.mxu2 }
 0x4cf   : > { %2096 = vst.msk [vmem:[#allocation2 + $0x38] sm:$0xf] %vm2081_vm3, %v2062_v46  ;;  %v2226_v45 = vadd.f32 %v2821_v22, %v2225_v51  ;;  %2606 = vmatmul.msk.bf16.gmra.mxu2 %vm570_vm0, %v2634_v53 }
 0x4d1   : > { %2264 = vst.msk [vmem:[%s4283_s26 + $0x8] sm:$0xff] %vm570_vm0, %v2226_v45 }
 0x4d6   : > { %v2064_v16 = vpop.permute.xlu0 %2063 }
 0x4d7   : > { %2097 = vst.msk [vmem:[#allocation2 + $0x3c] sm:$0xf] %vm2081_vm3, %v2064_v16 }
 0x4de   : > { %v2635_v62 = vld [vmem:[#allocation2 + $0x38] sm:$0xff] }
 0x4df   : > { %2607 = vmatmul.msk.bf16.gmra.mxu2 %vm570_vm0, %v2635_v62 }
 0x4f4   : > { %v2228_v9 = vpop.f32.mrf.mxu2 }
 0x4f5   : > { %v2229_v21 = vadd.f32 %v2821_v22, %v2228_v9 }
 0x4f7   : > { %2265 = vst.msk [vmem:[%s4283_s26 + $0x10] sm:$0xff] %vm570_vm0, %v2229_v21 }
 0x4fc   : > { %v2230_v17 = vpop.f32.mrf.mxu2 }
 0x4fd   : > { %v2231_v4 = vadd.f32 %v2821_v22, %v2230_v17 }
 0x4ff   : > { %2266 = vst.msk [vmem:[%s4283_s26 + $0x18] sm:$0xff] %vm570_vm0, %v2231_v4 }
 0x504   : > { %v2233_v29 = vpop.f32.mrf.mxu2 }
 0x505   : > { %v2234_v6 = vadd.f32 %v2821_v22, %v2233_v29 }
 0x507   : > { %2267 = vst.msk [vmem:[%s4283_s26 + $0x20] sm:$0xff] %vm570_vm0, %v2234_v6 }
 0x50c   : > { %v2235_v11 = vpop.f32.mrf.mxu2 }
 0x50d   : > { %v2236_v0 = vadd.f32 %v2821_v22, %v2235_v11 }
 0x50f   : > { %2268 = vst.msk [vmem:[%s4283_s26 + $0x28] sm:$0xff] %vm570_vm0, %v2236_v0 }
 0x514   : > { %v2238_v19 = vpop.f32.mrf.mxu2 }
 0x515   : > { %v2239_v36 = vadd.f32 %v2821_v22, %v2238_v19 }
 0x517   : > { %2269 = vst.msk [vmem:[%s4283_s26 + $0x30] sm:$0xff] %vm570_vm0, %v2239_v36 }
 0x51c   : > { %v2240_v47 = vpop.f32.mrf.mxu2 }
 0x51d   : > { %v2241_v13 = vadd.f32 %v2821_v22, %v2240_v47 }
 0x51f   : > { %2270 = vst.msk [vmem:[%s4283_s26 + $0x38] sm:$0xff] %vm570_vm0, %v2241_v13 }
 0x524   : > { %v2243_v30 = vpop.f32.mrf.mxu2 }
 0x525   : > { %v2244_v54 = vadd.f32 %v2821_v22, %v2243_v30 }
 0x527   : > { %2271 = vst.msk [vmem:[%s4283_s26 + $0x40] sm:$0xff] %vm570_vm0, %v2244_v54 }
 0x52c   : > { %v2245_v32 = vpop.f32.mrf.mxu2 }
 0x52d   : > { %v2246_v55 = vadd.f32 %v2821_v22, %v2245_v32 }
 0x52f   : > { %2272 = vst.msk [vmem:[%s4283_s26 + $0x48] sm:$0xff] %vm570_vm0, %v2246_v55 }
 0x542   : > { %v2248_v63 = vpop.f32.mrf.mxu2 }
 0x543   : > { %v2249_v20 = vadd.f32 %v2821_v22, %v2248_v63 }
 0x545   : > { %2273 = vst.msk [vmem:[%s4283_s26 + $0x50] sm:$0xff] %vm570_vm0, %v2249_v20 }
 0x54a   : > { %v2250_v41 = vpop.f32.mrf.mxu2 }
 0x54b   : > { %v2251_v33 = vadd.f32 %v2821_v22, %v2250_v41 }
 0x54d   : > { %2274 = vst.msk [vmem:[%s4283_s26 + $0x58] sm:$0xff] %vm570_vm0, %v2251_v33 }
 0x552   : > { %v2253_v25 = vpop.f32.mrf.mxu2 }
 0x553   : > { %v2254_v10 = vadd.f32 %v2821_v22, %v2253_v25 }
 0x555   : > { %2275 = vst.msk [vmem:[%s4283_s26 + $0x60] sm:$0xff] %vm570_vm0, %v2254_v10 }
 0x55a   : > { %v2255_v26 = vpop.f32.mrf.mxu2 }
 0x55b   : > { %v2256_v40 = vadd.f32 %v2821_v22, %v2255_v26 }
 0x55d   : > { %2276 = vst.msk [vmem:[%s4283_s26 + $0x68] sm:$0xff] %vm570_vm0, %v2256_v40 }
 0x562   : > { %v2258_v8 = vpop.f32.mrf.mxu2 }
 0x563   : > { %v2259_v43 = vadd.f32 %v2821_v22, %v2258_v8 }
 0x565   : > { %2277 = vst.msk [vmem:[%s4283_s26 + $0x70] sm:$0xff] %vm570_vm0, %v2259_v43 }
 0x56a   : > { %v2260_v28 = vpop.f32.mrf.mxu2 }
 0x56b   : > { %v2261_v57 = vadd.f32 %v2821_v22, %v2260_v28 }
 0x56d   : > { %2278 = vst.msk [vmem:[%s4283_s26 + $0x78] sm:$0xff] %vm570_vm0, %v2261_v57 }
 0x56e   : > { %3187 = shalt.err (!%p3184_p8)
}
 0x56f   : > { %s3252_s28 = smov 128   ;;  %s3253_s12 = smov 8  }
 0x570   : > { %2729 = dma.vmem_to_hbm [thread:$0]  (%p3428_p2), %s2294_s2, 2048, %s2296_s3, %s2280_s5, %s3252_s28, %s3252_s28, %s3253_s12  }
 0x571 PF: > { %p2771_p9 = scmp.ge.s32.totalorder %s3238_s20, 2  ;;  %s2310_s26 = sand.u32 1, %s3226_s17  }
 0x572   : > { %s2311_s30 = scalar_lea.sflag [#allocation5], %s2310_s26 }
 0x573   : > { %p2755_p10 = pnand %p2771_p9, %p3432_p4 }
 0x575   : > { %p2756_p12 = pneg %p2755_p10 }
 0x577   : > { %3221 = dma.done.wait (%p2756_p12), %s2311_s30, 2048  }
 0x578   : > { %3223 = vsyncadd (%p2756_p12), %s2311_s30, 4294965248  ;;  %p27_p13 = scmp.ge.s32.totalorder %s3402_s27, 6   ;;  %s4385_s17 = smov %s3230_s18 }
 0x579   : > { %s4386_s18 = smov %s3234_s19  ;;  %s4387_s19 = smov %s3413_s21 }
 0x57a   : > { %s4388_s20 = smov %s3402_s27  ;;  %29 = sbr.rel (!%p27_p13) target bundleno = 15 (0xf), region = 134 }
 0x57f   :  { %2317 = vsyncpa [#allocation4], 1 }
 0x580   :  { %2319 = vsyncpa [#allocation4 + $0x1], 1 }
 0x581   :  { %2320 = vsyncpa [#allocation7], 1 }
 0x582   :  { %2321 = vsyncpa [#allocation10], 1 }
 0x583   :  { %2322 = vsyncpa [#allocation13], 1 }
 0x584   :  { %2323 = vsyncpa [#allocation5], 1 }
 0x585   :  { %2325 = vsyncpa [#allocation5 + $0x1], 1 }

</bundles_post_ra>
